<compile_context>
chip_gen: v5e
topology: v5e:2x2
jax: 0.10.0
libtpu: 0.0.40
codegen_flags: <defaults>
</compile_context>

<pallas_src>
import functools

import jax
import jax.numpy as jnp
from jax.experimental import pallas as pl
from jax.experimental.pallas import tpu as pltpu


# ------------------------------ small helpers --------------------------------

def _round_up(v, m):
    return (v + m - 1) // m * m


def _vmem_capacity_bytes():
    try:
        return int(pltpu.get_tpu_info().vmem_capacity_bytes)
    except Exception:
        return 64 * 1024 * 1024      # conservative (v7x per-TC capacity)


def _choose_tiling(batch, npad, cp, x_bytes, w_bytes, attnf_bytes, budget):
    """Pick (bt, tq): batches per grid step and attn_f row-tile size."""
    weights = (5 * cp * cp + 2 * cp * 128 + 16 * cp) * w_bytes   # resident

    def need(bt, tq):
        m = bt * npad
        return (2 * m * cp * x_bytes            # x block (double-buffered)
                + 2 * m * cp * 4                # out block f32 (double-buffered)
                + 2 * bt * tq * npad * attnf_bytes   # attn_f tile (dbl-buffered)
                + m * cp * w_bytes              # attn VMEM scratch
                + 12 * m * cp * 4               # qkv + fused-qk temporaries
                + weights)

    tqs = []
    for t in (npad, 1024, 512, 256, 128):
        if t <= npad and npad % t == 0 and t not in tqs:
            tqs.append(t)
    bts = [b for b in (8, 4, 2, 1) if batch % b == 0]
    # Prefer >= 4 batch-grid steps (v7x: 2 steps per TensorCore so the pipeline
    # overlaps), then >= 2, then whatever fits.
    for min_steps in (4, 2, 1):
        for bt in bts:
            if batch // bt < min_steps:
                continue
            for tq in tqs:
                if need(bt, tq) <= budget:
                    return bt, tq
    # TODO(synk): for extreme N/C also tile the sequence / channel dims.
    return 1, tqs[-1]


# ---------------------------------- kernel -----------------------------------

def additive_token_mixer_kernel(x_ref, wqkv_ref, sp_ref, pw_ref, qch_ref,
                                kch_ref, dp_ref, out_ref, attnf_ref,
                                attn_s_ref, *, inv_n, n_real, tq):
    bt, npad, cp = out_ref.shape
    m = bt * npad
    mm_dtype = wqkv_ref.dtype
    j = pl.program_id(1)

    @pl.when(j == 0)
    def _compute():
        # Row-within-batch index over the flattened (bt*npad) sublane axis:
        # zeroes the roll wrap-around at each batch's sequence boundaries
        # (== Conv1d zero padding) without any integer modulo.
        pos = jax.lax.broadcasted_iota(jnp.int32, (bt, npad, 1), 1).reshape(m, 1)
        not_first = pos != 0
        not_last = pos != npad - 1

        def dwconv3(z, w3, b1):
            # Depthwise Conv1d(k=3, pad=1) in (N, C) layout; neighbor shifts
            # go through the XLU (roll) instead of concat/slice VMEM copies.
            zp = jnp.where(not_first, pltpu.roll(z, shift=1, axis=0), 0.0)
            zn = jnp.where(not_last, pltpu.roll(z, shift=m - 1, axis=0), 0.0)
            return zp * w3[0:1, :] + z * w3[1:2, :] + zn * w3[2:3, :] + b1

        # Fused qkv = Conv1d(dim, 3*dim, 1, bias=False) over all bt batches.
        x2 = x_ref[...].reshape(m, cp)
        qkv = jnp.dot(x2, wqkv_ref[...], preferred_element_type=jnp.float32)
        qk = qkv[:, 0:2 * cp]                 # q|k fused along lanes (aligned)
        v = qkv[:, 2 * cp:3 * cp]

        # SpatialOperation on q & k fused: one dwconv3/ReLU pass, one MXU
        # matvec for both gate logits (col 0 = q, col 1 = k). BN pre-folded.
        sp = sp_ref[...]
        h = jnp.maximum(dwconv3(qk, sp[0:3, :], sp[3:4, :]), 0.0)
        glog = jnp.dot(h.astype(mm_dtype), pw_ref[...],
                       preferred_element_type=jnp.float32)
        q_g3 = (qk[:, 0:cp] * jax.nn.sigmoid(glog[:, 0:1])).reshape(bt, npad, cp)
        k_g3 = (qk[:, cp:2 * cp] * jax.nn.sigmoid(glog[:, 1:2])).reshape(bt, npad, cp)

        # ChannelOperation: batched means (padded rows are zero so sum * 1/N
        # is the exact mean) + batched (bt, cp) @ (cp, cp) channel gates.
        mq = jnp.sum(q_g3, axis=1) * inv_n
        mk = jnp.sum(k_g3, axis=1) * inv_n
        cq = jax.nn.sigmoid(jnp.dot(mq.astype(mm_dtype), qch_ref[...],
                                    preferred_element_type=jnp.float32))
        ck = jax.nn.sigmoid(jnp.dot(mk.astype(mm_dtype), kch_ref[...],
                                    preferred_element_type=jnp.float32))
        s = (q_g3 * cq[:, None, :] + k_g3 * ck[:, None, :]).reshape(m, cp)

        dp = dp_ref[...]
        attn = dwconv3(s, dp[0:3, :], dp[3:4, :])
        out = dwconv3(attn * v, dp[4:7, :], dp[7:8, :])
        if n_real != npad:
            # Keep padded rows exactly zero so the padded regions of attn_f
            # and out stay clean even if the padded buffers are consumed.
            valid = pos < n_real
            attn = jnp.where(valid, attn, 0.0)
            out = jnp.where(valid, out, 0.0)

        attn_s_ref[...] = attn.astype(attn_s_ref.dtype).reshape(bt, npad, cp)
        out_ref[...] = out.reshape(bt, npad, cp).astype(out_ref.dtype)

    # Every j: one (tq, npad) row tile of attn_f[b] = attn[b] @ attn[b]^T.
    a_tile = attn_s_ref[:, pl.ds(pl.multiple_of(j * tq, 128), tq), :]
    a_full = attn_s_ref[...]
    attnf_ref[...] = jnp.einsum(
        "btc,bnc->btn", a_tile, a_full,
        preferred_element_type=jnp.float32).astype(attnf_ref.dtype)


# --------------------- host-side parameter preparation -----------------------

def _prepare_kernel_params(p, c, cp, matmul_dtype):
    """Fold / fuse / pre-transpose / zero-pad PyTorch-layout parameters."""
    def pad_c(a):                                  # pad last (channel) dim
        return jnp.pad(a, ((0, 0), (0, cp - c)))

    def pad_cc(a):                                 # pad (C, C) -> (Cp, Cp)
        return jnp.pad(a, ((0, cp - c), (0, cp - c)))

    # Fused, pre-transposed qkv weight: (Cp, 3*Cp); q/k/v each in a 128-aligned
    # lane chunk so the kernel slices without relayout.
    wqkv_t = jnp.concatenate(
        [pad_cc(p["wq"].T), pad_cc(p["wk"].T), pad_cc(p["wv"].T)],
        axis=1).astype(matmul_dtype)

    def sp_fold(prefix):
        s = p[f"{prefix}_bn_s"]
        w = p[f"{prefix}_dw_w"] * s                          # BN scale folded
        b = p[f"{prefix}_dw_b"] * s + p[f"{prefix}_bn_b"]    # BN shift folded
        return pad_c(jnp.concatenate([w, b], axis=0))        # (4, Cp)

    # q and k spatial branches fused along lanes: (4, 2*Cp).
    sp = jnp.concatenate([sp_fold("q"), sp_fold("k")], axis=1)

    # Spatial-gate MXU weight (2*Cp, 128): col 0 = q pointwise gate weights
    # (top half), col 1 = k pointwise gate weights (bottom half).
    pw = jnp.zeros((2 * cp, 128), jnp.float32)
    pw = pw.at[:cp, 0].set(jnp.pad(p["q_pw"][0], (0, cp - c)))
    pw = pw.at[cp:, 1].set(jnp.pad(p["k_pw"][0], (0, cp - c)))
    pw = pw.astype(matmul_dtype)

    q_ch_t = pad_cc(p["q_ch"].T).astype(matmul_dtype)
    k_ch_t = pad_cc(p["k_ch"].T).astype(matmul_dtype)

    dp = pad_c(jnp.concatenate(
        [p["dwc_w"], p["dwc_b"], p["proj_w"], p["proj_b"]], axis=0))   # (8, Cp)

    return wqkv_t, sp, pw, q_ch_t, k_ch_t, dp


# ---------------------------------- wrappers ----------------------------------

def additive_token_mixer_nlc(x_nlc, params, *, matmul_dtype=jnp.float32,
                             attnf_dtype=jnp.float32):
    """Channels-last entry point: x (B, N, C) -> (out (B, N, C), attn_f (B,1,N,N)).

    Use this in a model that keeps activations NLC end-to-end (no layout
    transposes).  matmul_dtype=bf16 is recommended on all TPU generations
    (v5e included) when bit-exact PyTorch parity is not required;
    attnf_dtype=bf16 halves the dominant attn_f HBM write.
    """
    B, N, C = x_nlc.shape
    cp = _round_up(C, 128)                  # lane-dense channels
    npad = _round_up(N, 128)                # lane-dense attn_f rows/cols

    x_bytes = jnp.dtype(matmul_dtype).itemsize
    a_bytes = jnp.dtype(attnf_dtype).itemsize
    budget = (_vmem_capacity_bytes() * 3) // 4
    bt, tq = _choose_tiling(B, npad, cp, x_bytes, x_bytes, a_bytes, budget)
    nq = npad // tq

    x = jnp.pad(x_nlc, ((0, 0), (0, npad - N), (0, cp - C))).astype(matmul_dtype)
    kparams = _prepare_kernel_params(params, C, cp, matmul_dtype)

    grid = (B // bt, nq)
    in_specs = [pl.BlockSpec((bt, npad, cp), lambda i, j: (i, 0, 0))]
    # Constant weights: resident once in VMEM, no per-step double buffering.
    in_specs += [pl.BlockSpec(memory_space=pltpu.MemorySpace.VMEM)
                 for _ in kparams]
    out_specs = [
        pl.BlockSpec((bt, npad, cp), lambda i, j: (i, 0, 0)),
        pl.BlockSpec((bt, tq, npad), lambda i, j: (i, j, 0)),
    ]
    out_shape = [
        jax.ShapeDtypeStruct((B, npad, cp), jnp.float32),
        jax.ShapeDtypeStruct((B, npad, npad), attnf_dtype),
    ]
    scratch_shapes = [pltpu.VMEM((bt, npad, cp), matmul_dtype)]

    flops = B * (2 * npad * cp * 3 * cp          # fused qkv matmul
                 + 2 * npad * 2 * cp * 128       # spatial-gate MXU matvec
                 + 2 * 2 * 2 * cp * cp           # channel-gate matmuls
                 + 2 * npad * npad * cp          # attn_f Gram matrix
                 + 50 * npad * cp)               # dwconvs + gating elementwise
    transcendentals = B * (2 * npad + 2 * cp)    # sigmoids
    bytes_accessed = (x.size * x.dtype.itemsize
                      + B * npad * cp * 4
                      + B * npad * npad * a_bytes
                      + sum(w.size * w.dtype.itemsize for w in kparams))

    out_pad, attnf_pad = pl.pallas_call(
        functools.partial(additive_token_mixer_kernel,
                          inv_n=1.0 / N, n_real=N, tq=tq),
        grid=grid,
        in_specs=in_specs,
        out_specs=out_specs,
        out_shape=out_shape,
        scratch_shapes=scratch_shapes,
        compiler_params=pltpu.CompilerParams(
            dimension_semantics=("parallel", "arbitrary"),
            vmem_limit_bytes=int(budget)),
        cost_estimate=pl.CostEstimate(
            flops=int(flops), transcendentals=int(transcendentals),
            bytes_accessed=int(bytes_accessed)),
    )(x, *kparams)

    return out_pad[:, :N, :C], attnf_pad[:, :N, :N][:, None, :, :]


def additive_token_mixer(x_ncl, params, *, matmul_dtype=jnp.float32,
                         attnf_dtype=jnp.float32):
    """PyTorch-layout parity wrapper: x (B, C, N) -> (out (B, C, N), attn_f).

    The NCL<->NLC transposes only exist here; prefer additive_token_mixer_nlc
    inside a model so no extra HBM layout round-trips are paid.
    """
    out_nlc, attn_f = additive_token_mixer_nlc(
        jnp.transpose(x_ncl, (0, 2, 1)), params,
        matmul_dtype=matmul_dtype, attnf_dtype=attnf_dtype)
    return jnp.transpose(out_nlc, (0, 2, 1)), attn_f


# --------------------------- parameter construction ---------------------------

def init_params(key, dim):
    ks = list(jax.random.split(key, 32))
    nxt = iter(ks)

    def nrm(shape, scale=0.1):
        return jax.random.normal(next(nxt), shape, jnp.float32) * scale

    p = {}
    # qkv: Conv1d(dim, 3*dim, 1, bias=False) -> weight (3*dim, dim)
    wqkv = nrm((3 * dim, dim))
    p["wq"], p["wk"], p["wv"] = wqkv[:dim], wqkv[dim:2 * dim], wqkv[2 * dim:]

    def oper(prefix):
        # SpatialOperation: depthwise Conv1d(dim,dim,3,pad=1,groups=dim)(+bias),
        # BatchNorm1d(dim) [eval], Conv1d(dim,1,1,bias=False)
        p[f"{prefix}_dw_w"] = nrm((3, dim))          # = torch weight (dim,1,3).T
        p[f"{prefix}_dw_b"] = nrm((1, dim))
        gamma = 1.0 + nrm((1, dim))
        beta = nrm((1, dim))
        rmean = nrm((1, dim))
        rvar = jax.random.uniform(next(nxt), (1, dim), jnp.float32, 0.5, 1.5)
        scale = gamma / jnp.sqrt(rvar + 1e-5)
        p[f"{prefix}_bn_s"] = scale
        p[f"{prefix}_bn_b"] = beta - rmean * scale
        p[f"{prefix}_pw"] = nrm((1, dim))            # Conv1d(dim,1,1) weight row
        # ChannelOperation: Conv1d(dim,dim,1,bias=False)
        p[f"{prefix}_ch"] = nrm((dim, dim))

    oper("q")
    oper("k")

    # dwc / proj: depthwise Conv1d(dim,dim,3,pad=1,groups=dim) (+bias)
    p["dwc_w"] = nrm((3, dim))
    p["dwc_b"] = nrm((1, dim))
    p["proj_w"] = nrm((3, dim))
    p["proj_b"] = nrm((1, dim))
    return p


# ------------------------ pure-JAX reference (NCL) ----------------------------

def _ref_dwconv3_ncl(x, w3c, b1c):
    xp = jnp.pad(x, ((0, 0), (0, 0), (1, 1)))
    w = w3c.T                                                        # (C, 3)
    return (xp[:, :, :-2] * w[None, :, 0:1]
            + xp[:, :, 1:-1] * w[None, :, 1:2]
            + xp[:, :, 2:] * w[None, :, 2:3]
            + b1c.T[None])


def _ref_spatial_ncl(x, dw_w, dw_b, bn_s, bn_b, pw):
    h = _ref_dwconv3_ncl(x, dw_w, dw_b)
    h = h * bn_s.T[None] + bn_b.T[None]
    h = jnp.maximum(h, 0.0)
    gate = jax.nn.sigmoid(jnp.einsum("c,bcn->bn", pw[0], h))[:, None, :]
    return x * gate


def _ref_channel_ncl(x, ch):
    mean = jnp.mean(x, axis=2, keepdims=True)
    gate = jax.nn.sigmoid(jnp.einsum("oc,bcn->bon", ch, mean))
    return x * gate


def reference_forward(x_ncl, p):
    q = jnp.einsum("oc,bcn->bon", p["wq"], x_ncl)
    k = jnp.einsum("oc,bcn->bon", p["wk"], x_ncl)
    v = jnp.einsum("oc,bcn->bon", p["wv"], x_ncl)
    q = _ref_channel_ncl(
        _ref_spatial_ncl(q, p["q_dw_w"], p["q_dw_b"], p["q_bn_s"],
                         p["q_bn_b"], p["q_pw"]), p["q_ch"])
    k = _ref_channel_ncl(
        _ref_spatial_ncl(k, p["k_dw_w"], p["k_dw_b"], p["k_bn_s"],
                         p["k_bn_b"], p["k_pw"]), p["k_ch"])
    attn = _ref_dwconv3_ncl(q + k, p["dwc_w"], p["dwc_b"])
    attn_f = jnp.einsum("bcn,bcm->bnm", attn, attn)[:, None]
    out = _ref_dwconv3_ncl(attn * v, p["proj_w"], p["proj_b"])
    return out, attn_f


# ------------------------------------ main ------------------------------------

if __name__ == "__main__":
    B, DIM, N = 2, 64, 16
    key = jax.random.PRNGKey(0)
    k_x, k_p = jax.random.split(key)

    x = jax.random.normal(k_x, (B, DIM, N), jnp.float32)   # PyTorch NCL layout
    params = init_params(k_p, DIM)

    ref_out, ref_attn_f = reference_forward(x, params)

    # f32 MXU path: parity with the PyTorch module (eval mode).
    out, attn_f = jax.jit(additive_token_mixer)(x, params)
    out = jax.block_until_ready(out)
    attn_f = jax.block_until_ready(attn_f)
    assert out.shape == (B, DIM, N)
    assert attn_f.shape == (B, 1, N, N)
    assert jnp.allclose(out, ref_out, rtol=1e-4, atol=1e-5)
    assert jnp.allclose(attn_f, ref_attn_f, rtol=1e-4, atol=1e-4)

    # bf16 MXU inputs + bf16 attn_f output; f32 accumulation, f32 VPU math.
    out16, attn16 = jax.jit(functools.partial(
        additive_token_mixer, matmul_dtype=jnp.bfloat16,
        attnf_dtype=jnp.bfloat16))(x, params)
    out16 = jax.block_until_ready(out16)
    attn16 = jax.block_until_ready(attn16)
    assert jnp.allclose(out16.astype(jnp.float32), ref_out, rtol=1e-1, atol=1e-1)
    assert jnp.allclose(attn16.astype(jnp.float32), ref_attn_f,
                        rtol=1e-1, atol=1e-1)

    print("KERNEL_OK")
</pallas_src>

<mosaic_0001>
module attributes {stable_mosaic.version = 11 : i64} {
  func.func @additive_token_mixer_kernel(%arg0: i32, %arg1: i32, %arg2: memref<1x128x128xf32, #tpu.memory_space<vmem>>, %arg3: memref<128x384xf32, #tpu.memory_space<vmem>>, %arg4: memref<4x256xf32, #tpu.memory_space<vmem>>, %arg5: memref<256x128xf32, #tpu.memory_space<vmem>>, %arg6: memref<128x128xf32, #tpu.memory_space<vmem>>, %arg7: memref<128x128xf32, #tpu.memory_space<vmem>>, %arg8: memref<8x128xf32, #tpu.memory_space<vmem>>, %arg9: memref<1x128x128xf32, #tpu.memory_space<vmem>>, %arg10: memref<1x128x128xf32, #tpu.memory_space<vmem>>, %arg11: memref<1x128x128xf32, #tpu.memory_space<vmem>>) attributes {dimension_semantics = [#tpu.dimension_semantics<parallel>, #tpu.dimension_semantics<arbitrary>], iteration_bounds = array<i64: 2, 1>, scalar_prefetch = 0 : i64, scratch_operands = 1 : i64, tpu.core_type = #tpu.core_type<tc>, window_params = [{transform_indices = @transform_0, window_bounds = array<i64: 1, 128, 128>}, {pipeline_mode = #tpu.pipeline_mode<synchronous>, transform_indices = @transform_1, window_bounds = array<i64: 128, 384>}, {pipeline_mode = #tpu.pipeline_mode<synchronous>, transform_indices = @transform_2, window_bounds = array<i64: 4, 256>}, {pipeline_mode = #tpu.pipeline_mode<synchronous>, transform_indices = @transform_3, window_bounds = array<i64: 256, 128>}, {pipeline_mode = #tpu.pipeline_mode<synchronous>, transform_indices = @transform_4, window_bounds = array<i64: 128, 128>}, {pipeline_mode = #tpu.pipeline_mode<synchronous>, transform_indices = @transform_5, window_bounds = array<i64: 128, 128>}, {pipeline_mode = #tpu.pipeline_mode<synchronous>, transform_indices = @transform_6, window_bounds = array<i64: 8, 128>}, {transform_indices = @transform_7, window_bounds = array<i64: 1, 128, 128>}, {transform_indices = @transform_8, window_bounds = array<i64: 1, 128, 128>}]} {
    %c0_i32 = arith.constant 0 : i32
    %0 = arith.cmpi eq, %arg1, %c0_i32 : i32
    %1 = arith.extui %0 : i1 to i32
    %c0_i32_0 = arith.constant 0 : i32
    %2 = arith.cmpi ne, %1, %c0_i32_0 : i32
    scf.if %2 {
      %10 = tpu.iota {dimensions = array<i32: 1>} : vector<1x128x1xi32>
      %11 = vector.shape_cast %10 : vector<1x128x1xi32> to vector<128x1xi32>
      %c0_i32_8 = arith.constant 0 : i32
      %12 = vector.broadcast %c0_i32_8 : i32 to vector<128x1xi32>
      %13 = arith.cmpi ne, %11, %12 : vector<128x1xi32>
      %c127_i32 = arith.constant 127 : i32
      %14 = vector.broadcast %c127_i32 : i32 to vector<128x1xi32>
      %15 = arith.cmpi ne, %11, %14 : vector<128x1xi32>
      %c0_9 = arith.constant 0 : index
      %c0_10 = arith.constant 0 : index
      %c0_11 = arith.constant 0 : index
      %16 = vector.load %arg2[%c0_9, %c0_10, %c0_11] : memref<1x128x128xf32, #tpu.memory_space<vmem>>, vector<1x128x128xf32>
      %17 = vector.shape_cast %16 : vector<1x128x128xf32> to vector<128x128xf32>
      %c0_12 = arith.constant 0 : index
      %c0_13 = arith.constant 0 : index
      %18 = vector.load %arg3[%c0_12, %c0_13] : memref<128x384xf32, #tpu.memory_space<vmem>>, vector<128x384xf32>
      %cst_14 = arith.constant dense<0.000000e+00> : vector<128x384xf32>
      %19 = tpu.matmul %17, %18, %cst_14 {dimension_numbers = #tpu.dot_dimension_numbers<[1], [0], [0], [1], [0, 0, 1, 1], [], []>} : vector<128x128xf32>, vector<128x384xf32>, vector<128x384xf32> -> vector<128x384xf32>
      %20 = vector.extract_strided_slice %19 {offsets = [0, 0], sizes = [128, 256], strides = [1, 1]} : vector<128x384xf32> to vector<128x256xf32>
      %21 = vector.extract_strided_slice %19 {offsets = [0, 256], sizes = [128, 128], strides = [1, 1]} : vector<128x384xf32> to vector<128x128xf32>
      %c0_15 = arith.constant 0 : index
      %c0_16 = arith.constant 0 : index
      %22 = vector.load %arg4[%c0_15, %c0_16] : memref<4x256xf32, #tpu.memory_space<vmem>>, vector<4x256xf32>
      %23 = vector.extract_strided_slice %22 {offsets = [0, 0], sizes = [3, 256], strides = [1, 1]} : vector<4x256xf32> to vector<3x256xf32>
      %24 = vector.extract_strided_slice %22 {offsets = [3, 0], sizes = [1, 256], strides = [1, 1]} : vector<4x256xf32> to vector<1x256xf32>
      %c1_i32 = arith.constant 1 : i32
      %25 = tpu.dynamic_rotate %20 by %c1_i32 dim 0 : vector<128x256xf32>, i32 -> vector<128x256xf32>
      %cst_17 = arith.constant 0.000000e+00 : f32
      %26 = vector.shape_cast %13 : vector<128x1xi1> to vector<128x1xi1>
      %27 = vector.broadcast %26 : vector<128x1xi1> to vector<128x256xi1>
      %28 = vector.broadcast %cst_17 : f32 to vector<128x256xf32>
      %29 = arith.select %27, %25, %28 : vector<128x256xi1>, vector<128x256xf32>
      %c127_i32_18 = arith.constant 127 : i32
      %30 = tpu.dynamic_rotate %20 by %c127_i32_18 dim 0 : vector<128x256xf32>, i32 -> vector<128x256xf32>
      %cst_19 = arith.constant 0.000000e+00 : f32
      %31 = vector.shape_cast %15 : vector<128x1xi1> to vector<128x1xi1>
      %32 = vector.broadcast %31 : vector<128x1xi1> to vector<128x256xi1>
      %33 = vector.broadcast %cst_19 : f32 to vector<128x256xf32>
      %34 = arith.select %32, %30, %33 : vector<128x256xi1>, vector<128x256xf32>
      %35 = vector.extract_strided_slice %23 {offsets = [0, 0], sizes = [1, 256], strides = [1, 1]} : vector<3x256xf32> to vector<1x256xf32>
      %36 = vector.broadcast %35 : vector<1x256xf32> to vector<128x256xf32>
      %37 = arith.mulf %29, %36 : vector<128x256xf32>
      %38 = vector.extract_strided_slice %23 {offsets = [1, 0], sizes = [1, 256], strides = [1, 1]} : vector<3x256xf32> to vector<1x256xf32>
      %39 = vector.broadcast %38 : vector<1x256xf32> to vector<128x256xf32>
      %40 = arith.mulf %20, %39 : vector<128x256xf32>
      %41 = arith.addf %37, %40 : vector<128x256xf32>
      %42 = vector.extract_strided_slice %23 {offsets = [2, 0], sizes = [1, 256], strides = [1, 1]} : vector<3x256xf32> to vector<1x256xf32>
      %43 = vector.broadcast %42 : vector<1x256xf32> to vector<128x256xf32>
      %44 = arith.mulf %34, %43 : vector<128x256xf32>
      %45 = arith.addf %41, %44 : vector<128x256xf32>
      %46 = vector.broadcast %24 : vector<1x256xf32> to vector<128x256xf32>
      %47 = arith.addf %45, %46 : vector<128x256xf32>
      %cst_20 = arith.constant 0.000000e+00 : f32
      %48 = vector.broadcast %cst_20 : f32 to vector<128x256xf32>
      %49 = arith.maximumf %47, %48 : vector<128x256xf32>
      %c0_21 = arith.constant 0 : index
      %c0_22 = arith.constant 0 : index
      %50 = vector.load %arg5[%c0_21, %c0_22] : memref<256x128xf32, #tpu.memory_space<vmem>>, vector<256x128xf32>
      %cst_23 = arith.constant dense<0.000000e+00> : vector<128x128xf32>
      %51 = tpu.matmul %49, %50, %cst_23 {dimension_numbers = #tpu.dot_dimension_numbers<[1], [0], [0], [1], [0, 0, 1, 1], [], []>} : vector<128x256xf32>, vector<256x128xf32>, vector<128x128xf32> -> vector<128x128xf32>
      %52 = vector.extract_strided_slice %20 {offsets = [0, 0], sizes = [128, 128], strides = [1, 1]} : vector<128x256xf32> to vector<128x128xf32>
      %53 = vector.extract_strided_slice %51 {offsets = [0, 0], sizes = [128, 1], strides = [1, 1]} : vector<128x128xf32> to vector<128x1xf32>
      %54 = arith.negf %53 : vector<128x1xf32>
      %55 = math.exp %54 : vector<128x1xf32>
      %cst_24 = arith.constant 1.000000e+00 : f32
      %56 = vector.broadcast %cst_24 : f32 to vector<128x1xf32>
      %57 = arith.addf %56, %55 : vector<128x1xf32>
      %58 = arith.divf %56, %57 : vector<128x1xf32>
      %59 = vector.broadcast %58 : vector<128x1xf32> to vector<128x128xf32>
      %60 = arith.mulf %52, %59 : vector<128x128xf32>
      %61 = vector.shape_cast %60 : vector<128x128xf32> to vector<1x128x128xf32>
      %62 = vector.extract_strided_slice %20 {offsets = [0, 128], sizes = [128, 128], strides = [1, 1]} : vector<128x256xf32> to vector<128x128xf32>
      %63 = vector.extract_strided_slice %51 {offsets = [0, 1], sizes = [128, 1], strides = [1, 1]} : vector<128x128xf32> to vector<128x1xf32>
      %64 = arith.negf %63 : vector<128x1xf32>
      %65 = math.exp %64 : vector<128x1xf32>
      %cst_25 = arith.constant 1.000000e+00 : f32
      %66 = vector.broadcast %cst_25 : f32 to vector<128x1xf32>
      %67 = arith.addf %66, %65 : vector<128x1xf32>
      %68 = arith.divf %66, %67 : vector<128x1xf32>
      %69 = vector.broadcast %68 : vector<128x1xf32> to vector<128x128xf32>
      %70 = arith.mulf %62, %69 : vector<128x128xf32>
      %71 = vector.shape_cast %70 : vector<128x128xf32> to vector<1x128x128xf32>
      %cst_26 = arith.constant dense<0.000000e+00> : vector<1x128xf32>
      %72 = vector.multi_reduction <add>, %61, %cst_26 [1] : vector<1x128x128xf32> to vector<1x128xf32>
      %cst_27 = arith.constant 6.250000e-02 : f32
      %73 = vector.broadcast %cst_27 : f32 to vector<1x128xf32>
      %74 = arith.mulf %72, %73 : vector<1x128xf32>
      %cst_28 = arith.constant dense<0.000000e+00> : vector<1x128xf32>
      %75 = vector.multi_reduction <add>, %71, %cst_28 [1] : vector<1x128x128xf32> to vector<1x128xf32>
      %cst_29 = arith.constant 6.250000e-02 : f32
      %76 = vector.broadcast %cst_29 : f32 to vector<1x128xf32>
      %77 = arith.mulf %75, %76 : vector<1x128xf32>
      %c0_30 = arith.constant 0 : index
      %c0_31 = arith.constant 0 : index
      %78 = vector.load %arg6[%c0_30, %c0_31] : memref<128x128xf32, #tpu.memory_space<vmem>>, vector<128x128xf32>
      %cst_32 = arith.constant dense<0.000000e+00> : vector<1x128xf32>
      %79 = tpu.matmul %74, %78, %cst_32 {dimension_numbers = #tpu.dot_dimension_numbers<[1], [0], [0], [1], [0, 0, 1, 1], [], []>} : vector<1x128xf32>, vector<128x128xf32>, vector<1x128xf32> -> vector<1x128xf32>
      %80 = arith.negf %79 : vector<1x128xf32>
      %81 = math.exp %80 : vector<1x128xf32>
      %cst_33 = arith.constant 1.000000e+00 : f32
      %82 = vector.broadcast %cst_33 : f32 to vector<1x128xf32>
      %83 = arith.addf %82, %81 : vector<1x128xf32>
      %84 = arith.divf %82, %83 : vector<1x128xf32>
      %c0_34 = arith.constant 0 : index
      %c0_35 = arith.constant 0 : index
      %85 = vector.load %arg7[%c0_34, %c0_35] : memref<128x128xf32, #tpu.memory_space<vmem>>, vector<128x128xf32>
      %cst_36 = arith.constant dense<0.000000e+00> : vector<1x128xf32>
      %86 = tpu.matmul %77, %85, %cst_36 {dimension_numbers = #tpu.dot_dimension_numbers<[1], [0], [0], [1], [0, 0, 1, 1], [], []>} : vector<1x128xf32>, vector<128x128xf32>, vector<1x128xf32> -> vector<1x128xf32>
      %87 = arith.negf %86 : vector<1x128xf32>
      %88 = math.exp %87 : vector<1x128xf32>
      %cst_37 = arith.constant 1.000000e+00 : f32
      %89 = vector.broadcast %cst_37 : f32 to vector<1x128xf32>
      %90 = arith.addf %89, %88 : vector<1x128xf32>
      %91 = arith.divf %89, %90 : vector<1x128xf32>
      %92 = vector.shape_cast %84 : vector<1x128xf32> to vector<1x1x128xf32>
      %93 = vector.broadcast %92 : vector<1x1x128xf32> to vector<1x128x128xf32>
      %94 = arith.mulf %61, %93 : vector<1x128x128xf32>
      %95 = vector.shape_cast %91 : vector<1x128xf32> to vector<1x1x128xf32>
      %96 = vector.broadcast %95 : vector<1x1x128xf32> to vector<1x128x128xf32>
      %97 = arith.mulf %71, %96 : vector<1x128x128xf32>
      %98 = arith.addf %94, %97 : vector<1x128x128xf32>
      %99 = vector.shape_cast %98 : vector<1x128x128xf32> to vector<128x128xf32>
      %c0_38 = arith.constant 0 : index
      %c0_39 = arith.constant 0 : index
      %100 = vector.load %arg8[%c0_38, %c0_39] : memref<8x128xf32, #tpu.memory_space<vmem>>, vector<8x128xf32>
      %101 = vector.extract_strided_slice %100 {offsets = [0, 0], sizes = [3, 128], strides = [1, 1]} : vector<8x128xf32> to vector<3x128xf32>
      %102 = vector.extract_strided_slice %100 {offsets = [3, 0], sizes = [1, 128], strides = [1, 1]} : vector<8x128xf32> to vector<1x128xf32>
      %c1_i32_40 = arith.constant 1 : i32
      %103 = tpu.dynamic_rotate %99 by %c1_i32_40 dim 0 : vector<128x128xf32>, i32 -> vector<128x128xf32>
      %cst_41 = arith.constant 0.000000e+00 : f32
      %104 = vector.shape_cast %13 : vector<128x1xi1> to vector<128x1xi1>
      %105 = vector.broadcast %104 : vector<128x1xi1> to vector<128x128xi1>
      %106 = vector.broadcast %cst_41 : f32 to vector<128x128xf32>
      %107 = arith.select %105, %103, %106 : vector<128x128xi1>, vector<128x128xf32>
      %c127_i32_42 = arith.constant 127 : i32
      %108 = tpu.dynamic_rotate %99 by %c127_i32_42 dim 0 : vector<128x128xf32>, i32 -> vector<128x128xf32>
      %cst_43 = arith.constant 0.000000e+00 : f32
      %109 = vector.shape_cast %15 : vector<128x1xi1> to vector<128x1xi1>
      %110 = vector.broadcast %109 : vector<128x1xi1> to vector<128x128xi1>
      %111 = vector.broadcast %cst_43 : f32 to vector<128x128xf32>
      %112 = arith.select %110, %108, %111 : vector<128x128xi1>, vector<128x128xf32>
      %113 = vector.extract_strided_slice %101 {offsets = [0, 0], sizes = [1, 128], strides = [1, 1]} : vector<3x128xf32> to vector<1x128xf32>
      %114 = vector.broadcast %113 : vector<1x128xf32> to vector<128x128xf32>
      %115 = arith.mulf %107, %114 : vector<128x128xf32>
      %116 = vector.extract_strided_slice %101 {offsets = [1, 0], sizes = [1, 128], strides = [1, 1]} : vector<3x128xf32> to vector<1x128xf32>
      %117 = vector.broadcast %116 : vector<1x128xf32> to vector<128x128xf32>
      %118 = arith.mulf %99, %117 : vector<128x128xf32>
      %119 = arith.addf %115, %118 : vector<128x128xf32>
      %120 = vector.extract_strided_slice %101 {offsets = [2, 0], sizes = [1, 128], strides = [1, 1]} : vector<3x128xf32> to vector<1x128xf32>
      %121 = vector.broadcast %120 : vector<1x128xf32> to vector<128x128xf32>
      %122 = arith.mulf %112, %121 : vector<128x128xf32>
      %123 = arith.addf %119, %122 : vector<128x128xf32>
      %124 = vector.broadcast %102 : vector<1x128xf32> to vector<128x128xf32>
      %125 = arith.addf %123, %124 : vector<128x128xf32>
      %126 = arith.mulf %125, %21 : vector<128x128xf32>
      %127 = vector.extract_strided_slice %100 {offsets = [4, 0], sizes = [3, 128], strides = [1, 1]} : vector<8x128xf32> to vector<3x128xf32>
      %128 = vector.extract_strided_slice %100 {offsets = [7, 0], sizes = [1, 128], strides = [1, 1]} : vector<8x128xf32> to vector<1x128xf32>
      %c1_i32_44 = arith.constant 1 : i32
      %129 = tpu.dynamic_rotate %126 by %c1_i32_44 dim 0 : vector<128x128xf32>, i32 -> vector<128x128xf32>
      %cst_45 = arith.constant 0.000000e+00 : f32
      %130 = vector.shape_cast %13 : vector<128x1xi1> to vector<128x1xi1>
      %131 = vector.broadcast %130 : vector<128x1xi1> to vector<128x128xi1>
      %132 = vector.broadcast %cst_45 : f32 to vector<128x128xf32>
      %133 = arith.select %131, %129, %132 : vector<128x128xi1>, vector<128x128xf32>
      %c127_i32_46 = arith.constant 127 : i32
      %134 = tpu.dynamic_rotate %126 by %c127_i32_46 dim 0 : vector<128x128xf32>, i32 -> vector<128x128xf32>
      %cst_47 = arith.constant 0.000000e+00 : f32
      %135 = vector.shape_cast %15 : vector<128x1xi1> to vector<128x1xi1>
      %136 = vector.broadcast %135 : vector<128x1xi1> to vector<128x128xi1>
      %137 = vector.broadcast %cst_47 : f32 to vector<128x128xf32>
      %138 = arith.select %136, %134, %137 : vector<128x128xi1>, vector<128x128xf32>
      %139 = vector.extract_strided_slice %127 {offsets = [0, 0], sizes = [1, 128], strides = [1, 1]} : vector<3x128xf32> to vector<1x128xf32>
      %140 = vector.broadcast %139 : vector<1x128xf32> to vector<128x128xf32>
      %141 = arith.mulf %133, %140 : vector<128x128xf32>
      %142 = vector.extract_strided_slice %127 {offsets = [1, 0], sizes = [1, 128], strides = [1, 1]} : vector<3x128xf32> to vector<1x128xf32>
      %143 = vector.broadcast %142 : vector<1x128xf32> to vector<128x128xf32>
      %144 = arith.mulf %126, %143 : vector<128x128xf32>
      %145 = arith.addf %141, %144 : vector<128x128xf32>
      %146 = vector.extract_strided_slice %127 {offsets = [2, 0], sizes = [1, 128], strides = [1, 1]} : vector<3x128xf32> to vector<1x128xf32>
      %147 = vector.broadcast %146 : vector<1x128xf32> to vector<128x128xf32>
      %148 = arith.mulf %138, %147 : vector<128x128xf32>
      %149 = arith.addf %145, %148 : vector<128x128xf32>
      %150 = vector.broadcast %128 : vector<1x128xf32> to vector<128x128xf32>
      %151 = arith.addf %149, %150 : vector<128x128xf32>
      %c16_i32 = arith.constant 16 : i32
      %152 = vector.broadcast %c16_i32 : i32 to vector<128x1xi32>
      %153 = arith.cmpi slt, %11, %152 : vector<128x1xi32>
      %cst_48 = arith.constant 0.000000e+00 : f32
      %154 = vector.shape_cast %153 : vector<128x1xi1> to vector<128x1xi1>
      %155 = vector.broadcast %154 : vector<128x1xi1> to vector<128x128xi1>
      %156 = vector.broadcast %cst_48 : f32 to vector<128x128xf32>
      %157 = arith.select %155, %125, %156 : vector<128x128xi1>, vector<128x128xf32>
      %cst_49 = arith.constant 0.000000e+00 : f32
      %158 = vector.shape_cast %153 : vector<128x1xi1> to vector<128x1xi1>
      %159 = vector.broadcast %158 : vector<128x1xi1> to vector<128x128xi1>
      %160 = vector.broadcast %cst_49 : f32 to vector<128x128xf32>
      %161 = arith.select %159, %151, %160 : vector<128x128xi1>, vector<128x128xf32>
      %162 = vector.shape_cast %157 : vector<128x128xf32> to vector<1x128x128xf32>
      %c0_50 = arith.constant 0 : index
      %c0_51 = arith.constant 0 : index
      %c0_52 = arith.constant 0 : index
      %163 = vector.load %arg11[%c0_50, %c0_51, %c0_52] : memref<1x128x128xf32, #tpu.memory_space<vmem>>, vector<1x128x128xf32>
      tpu.vector_store %arg11[%c0_50, %c0_51, %c0_52], %162 {strides = array<i32>} : memref<1x128x128xf32, #tpu.memory_space<vmem>>, vector<1x128x128xf32>,
      %164 = vector.shape_cast %161 : vector<128x128xf32> to vector<1x128x128xf32>
      %c0_53 = arith.constant 0 : index
      %c0_54 = arith.constant 0 : index
      %c0_55 = arith.constant 0 : index
      %165 = vector.load %arg9[%c0_53, %c0_54, %c0_55] : memref<1x128x128xf32, #tpu.memory_space<vmem>>, vector<1x128x128xf32>
      tpu.vector_store %arg9[%c0_53, %c0_54, %c0_55], %164 {strides = array<i32>} : memref<1x128x128xf32, #tpu.memory_space<vmem>>, vector<1x128x128xf32>,
    } else {
    }
    %c128_i32 = arith.constant 128 : i32
    %3 = arith.muli %arg1, %c128_i32 : i32
    %4 = tpu.assume_multiple %3, 128 : i32
    %c0 = arith.constant 0 : index
    %5 = arith.index_cast %4 : i32 to index
    %c0_1 = arith.constant 0 : index
    %6 = vector.load %arg11[%c0, %5, %c0_1] : memref<1x128x128xf32, #tpu.memory_space<vmem>>, vector<1x128x128xf32>
    %c0_2 = arith.constant 0 : index
    %c0_3 = arith.constant 0 : index
    %c0_4 = arith.constant 0 : index
    %7 = vector.load %arg11[%c0_2, %c0_3, %c0_4] : memref<1x128x128xf32, #tpu.memory_space<vmem>>, vector<1x128x128xf32>
    "tpu.trace_start"() <{level = 10 : i32, message = "btc,bnc->btn"}> : () -> ()
    %cst = arith.constant dense<0.000000e+00> : vector<1x128x128xf32>
    %8 = tpu.matmul %6, %7, %cst {dimension_numbers = #tpu.dot_dimension_numbers<[2], [2], [1], [1], [0, 0, 0, 1, 1, 1], [0], [0]>} : vector<1x128x128xf32>, vector<1x128x128xf32>, vector<1x128x128xf32> -> vector<1x128x128xf32>
    "tpu.trace_stop"() : () -> ()
    %c0_5 = arith.constant 0 : index
    %c0_6 = arith.constant 0 : index
    %c0_7 = arith.constant 0 : index
    %9 = vector.load %arg10[%c0_5, %c0_6, %c0_7] : memref<1x128x128xf32, #tpu.memory_space<vmem>>, vector<1x128x128xf32>
    tpu.vector_store %arg10[%c0_5, %c0_6, %c0_7], %8 {strides = array<i32>} : memref<1x128x128xf32, #tpu.memory_space<vmem>>, vector<1x128x128xf32>,
    return
  }
  func.func @transform_0(%arg0: i32, %arg1: i32) -> (i32, i32, i32) {
    %c0_i32 = arith.constant 0 : i32
    %c0_i32_0 = arith.constant 0 : i32
    %c0_i32_1 = arith.constant 0 : i32
    return %arg0, %c0_i32, %c0_i32_0 : i32, i32, i32
  }
  func.func @transform_1(%arg0: i32, %arg1: i32) -> (i32, i32) {
    %c0_i32 = arith.constant 0 : i32
    %c0_i32_0 = arith.constant 0 : i32
    %c0_i32_1 = arith.constant 0 : i32
    return %c0_i32, %c0_i32_0 : i32, i32
  }
  func.func @transform_2(%arg0: i32, %arg1: i32) -> (i32, i32) {
    %c0_i32 = arith.constant 0 : i32
    %c0_i32_0 = arith.constant 0 : i32
    %c0_i32_1 = arith.constant 0 : i32
    return %c0_i32, %c0_i32_0 : i32, i32
  }
  func.func @transform_3(%arg0: i32, %arg1: i32) -> (i32, i32) {
    %c0_i32 = arith.constant 0 : i32
    %c0_i32_0 = arith.constant 0 : i32
    %c0_i32_1 = arith.constant 0 : i32
    return %c0_i32, %c0_i32_0 : i32, i32
  }
  func.func @transform_4(%arg0: i32, %arg1: i32) -> (i32, i32) {
    %c0_i32 = arith.constant 0 : i32
    %c0_i32_0 = arith.constant 0 : i32
    %c0_i32_1 = arith.constant 0 : i32
    return %c0_i32, %c0_i32_0 : i32, i32
  }
  func.func @transform_5(%arg0: i32, %arg1: i32) -> (i32, i32) {
    %c0_i32 = arith.constant 0 : i32
    %c0_i32_0 = arith.constant 0 : i32
    %c0_i32_1 = arith.constant 0 : i32
    return %c0_i32, %c0_i32_0 : i32, i32
  }
  func.func @transform_6(%arg0: i32, %arg1: i32) -> (i32, i32) {
    %c0_i32 = arith.constant 0 : i32
    %c0_i32_0 = arith.constant 0 : i32
    %c0_i32_1 = arith.constant 0 : i32
    return %c0_i32, %c0_i32_0 : i32, i32
  }
  func.func @transform_7(%arg0: i32, %arg1: i32) -> (i32, i32, i32) {
    %c0_i32 = arith.constant 0 : i32
    %c0_i32_0 = arith.constant 0 : i32
    %c0_i32_1 = arith.constant 0 : i32
    return %arg0, %c0_i32, %c0_i32_0 : i32, i32, i32
  }
  func.func @transform_8(%arg0: i32, %arg1: i32) -> (i32, i32, i32) {
    %c0_i32 = arith.constant 0 : i32
    %c0_i32_0 = arith.constant 0 : i32
    return %arg0, %arg1, %c0_i32 : i32, i32, i32
  }
}

</mosaic_0001>

<bundles_post_ra>
// kernel: additive_token_mixer.1
= control target key start
LH: loop header
LB: loop body
LE: loop exit
PB: predicated region body
PF: predicated region fallthrough
CT: control target
= control target key end

     0   :  { %s3024_s27 = smov 0   ;;  %s3026_s28 = smov 0   ;;  %s4245_s0 = inlined_call_operand.vmem [shape: f32[2,128,128], index: 0, kind: input, shape index: {}]   ;;  %s4246_s1 = inlined_call_operand.vmem [shape: f32[128,384], index: 1, kind: input, shape index: {}]   ;;  %s4247_s2 = inlined_call_operand.vmem [shape: f32[4,256], index: 2, kind: input, shape index: {}]   ;;  %s4248_s3 = inlined_call_operand.vmem [shape: f32[256,128], index: 3, kind: input, shape index: {}]   ;;  %s4249_s4 = inlined_call_operand.vmem [shape: f32[128,128], index: 4, kind: input, shape index: {}]   ;;  %s4250_s5 = inlined_call_operand.vmem [shape: f32[128,128], index: 5, kind: input, shape index: {}]   ;;  %s4251_s6 = inlined_call_operand.vmem [shape: f32[8,128], index: 6, kind: input, shape index: {}]   ;;  %s4252_s7 = inlined_call_operand.vmem [shape: f32[2,128,128], index: 7, kind: output, shape index: {0}]   ;;  %s4253_s8 = inlined_call_operand.vmem [shape: f32[2,128,128], index: 8, kind: output, shape index: {1}]  }
   0x1   :  { %s3028_s29 = smov 0  }
   0x2 LB: > { %s31_s30 = sadd.s32 1, %s2970_s28  ;;  %p2764_p0 = scmp.ge.s32.totalorder %s2974_s29, 1  ;;  %s2974_s29 = sphi %s3028_s29, %s19_s29   ;;  %s2970_s28 = sphi %s3026_s28, %s4269_s28   ;;  %s2966_s27 = sphi %s3024_s27, %s4268_s27  }
   0x3   : > { %p33_p1 = scmp.ge.s32.totalorder %s31_s30, 2  ;;  %p279_p2 = scmp.lt.s32.totalorder %s2974_s29, 3 }
   0x5   : > { %s4271_s30 = smov (%p33_p1, %s31_s30), 0  ;;  %p280_p3 = pnand %p2764_p0, %p279_p2 }
   0x7   : > { %283 = sbr.rel (%p280_p3) target bundleno = 1205 (0x4b5), region = 48 }
   0xc   : > { %v456_v0 = vld [vmem:[%s4246_s1 + $0x168] sm:$0xff]  ;;  %v453_v1 = vld [vmem:[%s4246_s1 + $0x150] sm:$0xff]  ;;  %p322_p4 = scmp.lt.s32.totalorder %s2966_s27, 1  ;;  %v450_v2 = vld [vmem:[%s4246_s1 + $0x138] sm:$0xff]  ;;  %v2976_v5 = vmov 0.0  }
   0xd   : > { %459 = vmatpush.msra.mxu0 %v456_v0  ;;  %2794 = vmatpush.msra.mxu1 %v456_v0  ;;  %v447_v3 = vld [vmem:[%s4246_s1 + $0x120] sm:$0xff]  ;;  %v444_v4 = vld [vmem:[%s4246_s1 + $0x108] sm:$0xff]  ;;  %v441_v6 = vld [vmem:[%s4246_s1 + $0xf0] sm:$0xff] }
   0xe   : > { %s4273_s27 = smov (!%p322_p4, %s2966_s27), 1  ;;  %v438_v7 = vld [vmem:[%s4246_s1 + $0xd8] sm:$0xff]  ;;  %v435_v8 = vld [vmem:[%s4246_s1 + $0xc0] sm:$0xff]  ;;  %v432_v9 = vld [vmem:[%s4246_s1 + $0xa8] sm:$0xff] }
   0xf   : > { %460 = vmatpush.msra.mxu0 %v453_v1  ;;  %2795 = vmatpush.msra.mxu1 %v453_v1  ;;  %s3054_s17 = sshll.u32 %s4273_s27, 7  ;;  %v429_v10 = vld [vmem:[%s4246_s1 + $0x90] sm:$0xff]  ;;  %v426_v11 = vld [vmem:[%s4246_s1 + $0x78] sm:$0xff]  ;;  %v423_v12 = vld [vmem:[%s4246_s1 + $0x60] sm:$0xff] }
  0x10   : > { %s3060_s20 = scalar_lea.vmem %s4252_s7, %s3054_s17  ;;  %v420_v13 = vld [vmem:[%s4246_s1 + $0x48] sm:$0xff]  ;;  %v417_v14 = vld [vmem:[%s4246_s1 + $0x30] sm:$0xff]  ;;  %v458_v15 = vld [vmem:[%s4246_s1 + $0x178] sm:$0xff]  ;;  %s3119_s13 = scalar_lea.vmem %s4245_s0, %s3054_s17 }
  0x11   : > { %461 = vmatpush.msra.mxu0 %v450_v2  ;;  %2796 = vmatpush.msra.mxu1 %v450_v2  ;;  %2515 = vst [vmem:[%s3060_s20 + $0x10] sm:$0xff] %v2976_v5  ;;  %v455_v16 = vld [vmem:[%s4246_s1 + $0x160] sm:$0xff]  ;;  %v414_v17 = vld [vmem:[%s4246_s1 + $0x18] sm:$0xff]  ;;  %v3128_v20 = vld [vmem:[%s3119_s13 + $0x48] sm:$0xff]  ;;  %s4218_s9 = scalar_lea.vmem %s4253_s8, %s3054_s17 }
  0x12   : > { %2516 = vst [vmem:[%s3060_s20 + $0x18] sm:$0xff] %v2976_v5  ;;  %589 = vmatpush.msra.mxu2 %v458_v15  ;;  %v411_v18 = vld [vmem:[%s4246_s1] sm:$0xff]  ;;  %v457_v21 = vld [vmem:[%s4246_s1 + $0x170] sm:$0xff]  ;;  %v454_v22 = vld [vmem:[%s4246_s1 + $0x158] sm:$0xff] }
  0x13   : > { %462 = vmatpush.msra.mxu0 %v447_v3  ;;  %2797 = vmatpush.msra.mxu1 %v447_v3  ;;  %2517 = vst [vmem:[%s3060_s20 + $0x20] sm:$0xff] %v2976_v5  ;;  %v3125_v19 = vld [vmem:[%s3119_s13] sm:$0xff]  ;;  %v452_v23 = vld [vmem:[%s4246_s1 + $0x148] sm:$0xff]  ;;  %v449_v24 = vld [vmem:[%s4246_s1 + $0x130] sm:$0xff] }
  0x14   : > { %2518 = vst [vmem:[%s3060_s20 + $0x28] sm:$0xff] %v2976_v5  ;;  %590 = vmatpush.msra.mxu2 %v455_v16  ;;  %v451_v25 = vld [vmem:[%s4246_s1 + $0x140] sm:$0xff]  ;;  %v446_v26 = vld [vmem:[%s4246_s1 + $0x118] sm:$0xff]  ;;  %v448_v27 = vld [vmem:[%s4246_s1 + $0x128] sm:$0xff] }
  0x15   : > { %463 = vmatpush.msra.mxu0 %v444_v4  ;;  %2798 = vmatpush.msra.mxu1 %v444_v4  ;;  %2519 = vst [vmem:[%s3060_s20 + $0x30] sm:$0xff] %v2976_v5  ;;  %v443_v28 = vld [vmem:[%s4246_s1 + $0x100] sm:$0xff]  ;;  %v3157_v29 = vld [vmem:[%s3119_s13 + $0x8] sm:$0xff]  ;;  %v3160_v30 = vld [vmem:[%s3119_s13 + $0x50] sm:$0xff] }
  0x16   : > { %2520 = vst [vmem:[%s3060_s20 + $0x38] sm:$0xff] %v2976_v5  ;;  %591 = vmatpush.msra.mxu2 %v452_v23  ;;  %v445_v31 = vld [vmem:[%s4246_s1 + $0x110] sm:$0xff]  ;;  %v442_v32 = vld [vmem:[%s4246_s1 + $0xf8] sm:$0xff]  ;;  %v440_v33 = vld [vmem:[%s4246_s1 + $0xe8] sm:$0xff] }
  0x17   : > { %464 = vmatpush.msra.mxu0 %v441_v6  ;;  %2799 = vmatpush.msra.mxu1 %v441_v6  ;;  %2521 = vst [vmem:[%s3060_s20 + $0x40] sm:$0xff] %v2976_v5  ;;  %v437_v34 = vld [vmem:[%s4246_s1 + $0xd0] sm:$0xff]  ;;  %v439_v35 = vld [vmem:[%s4246_s1 + $0xe0] sm:$0xff]  ;;  %v434_v36 = vld [vmem:[%s4246_s1 + $0xb8] sm:$0xff] }
  0x18   : > { %2522 = vst [vmem:[%s3060_s20 + $0x48] sm:$0xff] %v2976_v5  ;;  %592 = vmatpush.msra.mxu2 %v449_v24  ;;  %v436_v37 = vld [vmem:[%s4246_s1 + $0xc8] sm:$0xff]  ;;  %v431_v38 = vld [vmem:[%s4246_s1 + $0xa0] sm:$0xff]  ;;  %v3189_v39 = vld [vmem:[%s3119_s13 + $0x10] sm:$0xff] }
  0x19   : > { %465 = vmatpush.msra.mxu0 %v438_v7  ;;  %2800 = vmatpush.msra.mxu1 %v438_v7  ;;  %2523 = vst [vmem:[%s3060_s20 + $0x50] sm:$0xff] %v2976_v5  ;;  %v3192_v40 = vld [vmem:[%s3119_s13 + $0x58] sm:$0xff]  ;;  %v433_v41 = vld [vmem:[%s4246_s1 + $0xb0] sm:$0xff]  ;;  %v428_v43 = vld [vmem:[%s4246_s1 + $0x88] sm:$0xff] }
  0x1a   : > { %2524 = vst [vmem:[%s3060_s20 + $0x58] sm:$0xff] %v2976_v5  ;;  %593 = vmatpush.msra.mxu2 %v446_v26  ;;  %v430_v42 = vld [vmem:[%s4246_s1 + $0x98] sm:$0xff]  ;;  %v425_v44 = vld [vmem:[%s4246_s1 + $0x70] sm:$0xff]  ;;  %v427_v45 = vld [vmem:[%s4246_s1 + $0x80] sm:$0xff] }
  0x1b   : > { %466 = vmatpush.msra.mxu0 %v435_v8  ;;  %2801 = vmatpush.msra.mxu1 %v435_v8  ;;  %2525 = vst [vmem:[%s3060_s20 + $0x60] sm:$0xff] %v2976_v5  ;;  %v422_v46 = vld [vmem:[%s4246_s1 + $0x58] sm:$0xff]  ;;  %v424_v47 = vld [vmem:[%s4246_s1 + $0x68] sm:$0xff]  ;;  %v419_v48 = vld [vmem:[%s4246_s1 + $0x40] sm:$0xff] }
  0x1c   : > { %2526 = vst [vmem:[%s3060_s20 + $0x68] sm:$0xff] %v2976_v5  ;;  %594 = vmatpush.msra.mxu2 %v443_v28  ;;  %v398_v49 = vld [vmem:[%s3119_s13 + $0x18] sm:$0xff]  ;;  %v3222_v50 = vld [vmem:[%s3119_s13 + $0x60] sm:$0xff]  ;;  %v421_v51 = vld [vmem:[%s4246_s1 + $0x50] sm:$0xff] }
  0x1d   : > { %467 = vmatpush.msra.mxu0 %v432_v9  ;;  %2802 = vmatpush.msra.mxu1 %v432_v9  ;;  %2527 = vst [vmem:[%s3060_s20 + $0x70] sm:$0xff] %v2976_v5  ;;  %v418_v52 = vld [vmem:[%s4246_s1 + $0x38] sm:$0xff]  ;;  %v416_v53 = vld [vmem:[%s4246_s1 + $0x28] sm:$0xff]  ;;  %v413_v54 = vld [vmem:[%s4246_s1 + $0x10] sm:$0xff] }
  0x1e   : > { %2528 = vst [vmem:[%s3060_s20 + $0x78] sm:$0xff] %v2976_v5  ;;  %595 = vmatpush.msra.mxu2 %v440_v33  ;;  %v415_v55 = vld [vmem:[%s4246_s1 + $0x20] sm:$0xff]  ;;  %v412_v56 = vld [vmem:[%s4246_s1 + $0x8] sm:$0xff]  ;;  %v3252_v60 = vld [vmem:[%s3119_s13 + $0x70] sm:$0xff] }
  0x1f   : > { %468 = vmatpush.msra.mxu0 %v429_v10  ;;  %2803 = vmatpush.msra.mxu1 %v429_v10  ;;  %v399_v57 = vld [vmem:[%s3119_s13 + $0x20] sm:$0xff]  ;;  %v3246_v58 = vld [vmem:[%s3119_s13 + $0x68] sm:$0xff]  ;;  %v401_v61 = vld [vmem:[%s3119_s13 + $0x30] sm:$0xff] }
  0x20   : > { %596 = vmatpush.msra.mxu2 %v437_v34  ;;  %v400_v59 = vld [vmem:[%s3119_s13 + $0x28] sm:$0xff]  ;;  %v3258_v62 = vld [vmem:[%s3119_s13 + $0x78] sm:$0xff]  ;;  %v403_v0 = vld [vmem:[%s3119_s13 + $0x40] sm:$0xff] }
  0x21   : > { %469 = vmatpush.msra.mxu0 %v426_v11  ;;  %2804 = vmatpush.msra.mxu1 %v426_v11  ;;  %v402_v63 = vld [vmem:[%s3119_s13 + $0x38] sm:$0xff]  ;;  %v1176_v4 = vld [vmem:[%s4248_s3 + $0x70] sm:$0xff]  ;;  %v1175_v5 = vld [vmem:[%s4248_s3 + $0x68] sm:$0xff] }
  0x22   : > { %597 = vmatpush.msra.mxu2 %v434_v36  ;;  %v1177_v3 = vld [vmem:[%s4248_s3 + $0x78] sm:$0xff]  ;;  %v1174_v6 = vld [vmem:[%s4248_s3 + $0x60] sm:$0xff]  ;;  %v1172_v10 = vld [vmem:[%s4248_s3 + $0x50] sm:$0xff] }
  0x23   : > { %470 = vmatpush.msra.mxu0 %v423_v12  ;;  %2805 = vmatpush.msra.mxu1 %v423_v12  ;;  %v1173_v9 = vld [vmem:[%s4248_s3 + $0x58] sm:$0xff]  ;;  %v1171_v11 = vld [vmem:[%s4248_s3 + $0x48] sm:$0xff]  ;;  %v1170_v12 = vld [vmem:[%s4248_s3 + $0x40] sm:$0xff] }
  0x24   : > { %598 = vmatpush.msra.mxu2 %v431_v38  ;;  %2810 = vmatpush.msra.mxu3 %v1177_v3  ;;  %v1169_v15 = vld [vmem:[%s4248_s3 + $0x38] sm:$0xff]  ;;  %v1168_v16 = vld [vmem:[%s4248_s3 + $0x30] sm:$0xff]  ;;  %v1163_v23 = vld [vmem:[%s4248_s3 + $0x8] sm:$0xff] }
  0x25   : > { %471 = vmatpush.msra.mxu0 %v420_v13  ;;  %2806 = vmatpush.msra.mxu1 %v420_v13  ;;  %v1162_v24 = vld [vmem:[%s4248_s3] sm:$0xff] }
  0x26   : > { %599 = vmatpush.msra.mxu2 %v428_v43  ;;  %2811 = vmatpush.msra.mxu3 %v1176_v4 }
  0x27   : > { %472 = vmatpush.msra.mxu0 %v417_v14  ;;  %2807 = vmatpush.msra.mxu1 %v417_v14 }
  0x28   : > { %600 = vmatpush.msra.mxu2 %v425_v44  ;;  %2812 = vmatpush.msra.mxu3 %v1175_v5 }
  0x29   : > { %473 = vmatpush.msra.mxu0 %v414_v17  ;;  %2808 = vmatpush.msra.mxu1 %v414_v17  ;;  %v1167_v17 = vld [vmem:[%s4248_s3 + $0x28] sm:$0xff] }
  0x2a   : > { %601 = vmatpush.msra.mxu2 %v422_v46  ;;  %2813 = vmatpush.msra.mxu3 %v1174_v6 }
  0x2b   : > { %474 = vmatpush.msra.mxu0 %v411_v18  ;;  %2809 = vmatpush.msra.mxu1 %v411_v18  ;;  %v1166_v18 = vld [vmem:[%s4248_s3 + $0x20] sm:$0xff] }
  0x2c   : > { %475 = vmatmul.f32.vlgmr.msra.gmra.mxu0 %v3125_v19  ;;  %502 = vmatmul.f32.vlgmr.msra.gmra.mxu1 %v3128_v20 }
  0x2d   : > { %524 = vmatpush.msrb.mxu1 %v457_v21  ;;  %602 = vmatpush.msra.mxu2 %v419_v48  ;;  %v1165_v21 = vld [vmem:[%s4248_s3 + $0x18] sm:$0xff] }
  0x2e   : > { %2814 = vmatpush.msra.mxu3 %v1173_v9 }
  0x2f   : > { %525 = vmatpush.msrb.mxu1 %v454_v22  ;;  %603 = vmatpush.msra.mxu2 %v416_v53  ;;  %v1164_v22 = vld [vmem:[%s4248_s3 + $0x10] sm:$0xff] }
  0x30   : > { %2815 = vmatpush.msra.mxu3 %v1172_v10 }
  0x31   : > { %526 = vmatpush.msrb.mxu1 %v451_v25  ;;  %604 = vmatpush.msra.mxu2 %v413_v54 }
  0x32   : > { %605 = vmatmul.f32.vlgmr.msra.gmra.mxu2 %v3125_v19  ;;  %2816 = vmatpush.msra.mxu3 %v1171_v11 }
  0x33   : > { %527 = vmatpush.msrb.mxu1 %v448_v27  ;;  %1194 = vmatpush.msrb.mxu2 %v1177_v3 }
  0x34   : > { %478 = vmatmul.f32.gmra.mxu0 %v3157_v29  ;;  %505 = vmatmul.f32.gmra.mxu1 %v3160_v30 }
  0x35   : > { %528 = vmatpush.msrb.mxu1 %v445_v31  ;;  %1195 = vmatpush.msrb.mxu2 %v1176_v4  ;;  %v3355_v31 = vld [vmem:[%s4247_s2] sm:$0xff] }
  0x36   : > { %2817 = vmatpush.msra.mxu3 %v1170_v12  ;;  %v952_v33 = vperm.slane %v3355_v31, 1  ;;  %v1022_v43 = vperm.slane %v3355_v31, 2 }
  0x37   : > { %529 = vmatpush.msrb.mxu1 %v442_v32  ;;  %1196 = vmatpush.msrb.mxu2 %v1175_v5 }
  0x38   : > { %2818 = vmatpush.msra.mxu3 %v1169_v15  ;;  %v3405_v54 = vperm.slane %v1022_v43, 2 }
  0x39   : > { %530 = vmatpush.msrb.mxu1 %v439_v35  ;;  %1197 = vmatpush.msrb.mxu2 %v1174_v6  ;;  %v914_v35 = vperm.slane %v3355_v31, 0 }
  0x3a   : > { %608 = vmatmul.f32.gmra.mxu2 %v3157_v29  ;;  %2819 = vmatpush.msra.mxu3 %v1168_v16 }
  0x3b   : > { %531 = vmatpush.msrb.mxu1 %v436_v37  ;;  %1198 = vmatpush.msrb.mxu2 %v1173_v9 }
  0x3c   : > { %481 = vmatmul.f32.gmra.mxu0 %v3189_v39  ;;  %508 = vmatmul.f32.gmra.mxu1 %v3192_v40 }
  0x3d   : > { %532 = vmatpush.msrb.mxu1 %v433_v41  ;;  %1199 = vmatpush.msrb.mxu2 %v1172_v10 }
  0x3e   : > { %2820 = vmatpush.msra.mxu3 %v1167_v17 }
  0x3f   : > { %533 = vmatpush.msrb.mxu1 %v430_v42  ;;  %1200 = vmatpush.msrb.mxu2 %v1171_v11 }
  0x40   : > { %2821 = vmatpush.msra.mxu3 %v1166_v18 }
  0x41   : > { %534 = vmatpush.msrb.mxu1 %v427_v45  ;;  %1201 = vmatpush.msrb.mxu2 %v1170_v12 }
  0x42   : > { %611 = vmatmul.f32.gmra.mxu2 %v3189_v39  ;;  %2822 = vmatpush.msra.mxu3 %v1165_v21 }
  0x43   : > { %535 = vmatpush.msrb.mxu1 %v424_v47  ;;  %1202 = vmatpush.msrb.mxu2 %v1169_v15  ;;  %v3383_v47 = vperm.slane %v914_v35, 0 }
  0x44   : > { %484 = vmatmul.f32.gmra.mxu0 %v398_v49  ;;  %511 = vmatmul.f32.gmra.mxu1 %v3222_v50 }
  0x45   : > { %536 = vmatpush.msrb.mxu1 %v421_v51  ;;  %1203 = vmatpush.msrb.mxu2 %v1168_v16 }
  0x46   : > { %2823 = vmatpush.msra.mxu3 %v1164_v22 }
  0x47   : > { %537 = vmatpush.msrb.mxu1 %v418_v52  ;;  %1204 = vmatpush.msrb.mxu2 %v1167_v17 }
  0x48   : > { %2824 = vmatpush.msra.mxu3 %v1163_v23 }
  0x49   : > { %538 = vmatpush.msrb.mxu1 %v415_v55  ;;  %1205 = vmatpush.msrb.mxu2 %v1166_v18 }
  0x4a   : > { %614 = vmatmul.f32.gmra.mxu2 %v398_v49  ;;  %2825 = vmatpush.msra.mxu3 %v1162_v24 }
  0x4b   : > { %539 = vmatpush.msrb.mxu1 %v412_v56  ;;  %1206 = vmatpush.msrb.mxu2 %v1165_v21 }
  0x4c   : > { %487 = vmatmul.f32.gmra.mxu0 %v399_v57  ;;  %514 = vmatmul.f32.gmra.mxu1 %v3246_v58 }
  0x4d   : > { %1207 = vmatpush.msrb.mxu2 %v1164_v22 }
  0x4f   : > { %1208 = vmatpush.msrb.mxu2 %v1163_v23 }
  0x51   : > { %1209 = vmatpush.msrb.mxu2 %v1162_v24 }
  0x52   : > { %617 = vmatmul.f32.gmra.mxu2 %v399_v57 }
  0x54   : > { %490 = vmatmul.f32.gmra.mxu0 %v400_v59  ;;  %517 = vmatmul.f32.gmra.mxu1 %v3252_v60 }
  0x5a   : > { %620 = vmatmul.f32.gmra.mxu2 %v400_v59 }
  0x5c   : > { %493 = vmatmul.f32.gmra.mxu0 %v401_v61  ;;  %520 = vmatmul.f32.gmra.mxu1 %v3258_v62 }
  0x62   : > { %623 = vmatmul.f32.gmra.mxu2 %v401_v61 }
  0x64   : > { %496 = vmatmul.f32.gmra.mxu0 %v402_v63  ;;  %540 = vmatmul.f32.vlgmr.msrb.gmra.mxu1 %v3125_v19 }
  0x6a   : > { %626 = vmatmul.f32.gmra.mxu2 %v402_v63 }
  0x6c   : > { %499 = vmatmul.f32.gmra.mxu0 %v403_v0  ;;  %543 = vmatmul.f32.gmra.mxu1 %v3157_v29 }
  0x72   : > { %629 = vmatmul.f32.gmra.mxu2 %v403_v0 }
  0x74   : > { %546 = vmatmul.f32.gmra.mxu1 %v3189_v39 }
  0x7a   : > { %632 = vmatmul.f32.gmra.mxu2 %v3128_v20 }
  0x7c   : > { %549 = vmatmul.f32.gmra.mxu1 %v398_v49 }
  0x82   : > { %635 = vmatmul.f32.gmra.mxu2 %v3160_v30 }
  0x84   : > { %552 = vmatmul.f32.gmra.mxu1 %v399_v57 }
  0x8a   : > { %638 = vmatmul.f32.gmra.mxu2 %v3192_v40 }
  0x8c   : > { %555 = vmatmul.f32.gmra.mxu1 %v400_v59 }
  0x92   : > { %641 = vmatmul.f32.gmra.mxu2 %v3222_v50 }
  0x94   : > { %558 = vmatmul.f32.gmra.mxu1 %v401_v61  ;;  %v1092_v61 = vperm.slane %v3355_v31, 3 }
  0x96   : > { %v3426_v10 = vperm.slane %v1092_v61, 3 }
  0x9a   : > { %644 = vmatmul.f32.gmra.mxu2 %v3246_v58 }
  0x9c   : > { %561 = vmatmul.f32.gmra.mxu1 %v402_v63 }
  0xa2   : > { %647 = vmatmul.f32.gmra.mxu2 %v3252_v60 }
  0xa4   : > { %564 = vmatmul.f32.gmra.mxu1 %v403_v0 }
  0xa9   : > { %v3270_v1 = vpop.f32.mrf.mxu0  ;;  %v3272_v2 = vpop.f32.mrf.mxu1 }
  0xaa   : > { %650 = vmatmul.f32.gmra.mxu2 %v3258_v62  ;;  %v655_v37 = vrot.slane %v3270_v1, 7  ;;  %v784_v39 = vrot.slane %v3270_v1, 1 }
  0xac   : > { %567 = vmatmul.f32.gmra.mxu1 %v3128_v20 }
  0xb1   : > { %v3287_v7 = vpop.f32.mrf.mxu0  ;;  %v3289_v8 = vpop.f32.mrf.mxu1 }
  0xb2   : > { %v786_v38 = vrot.slane %v3287_v7, 1 }
  0xb4   : > { %570 = vmatmul.f32.gmra.mxu1 %v3160_v30  ;;  %v346_v30 = vlaneseq }
  0xb5   : > { %v3345_v27 = vpop.f32.mrf.mxu2 }
  0xb6   : > { %4256 = vst [vmem:[#allocation3_spill] sm:$0xff] %v3345_v27  ;;  %v3361_v34 = vshrl.u32 %v346_v30, 7 }
  0xb8   : > { %v3365_v36 = vadd.s32 120, %v3361_v34  ;;  %vm363_vm0 = vcmp.ne.s32.totalorder %v3361_v34, 0  ;;  %vm687_vm1 = vcmp.lt.s32.totalorder %v3361_v34, 1  ;;  %vm816_vm2 = vcmp.lt.s32.totalorder %v3361_v34, 7 }
  0xb9   : > { %v3305_v13 = vpop.f32.mrf.mxu0  ;;  %v3307_v14 = vpop.f32.mrf.mxu1  ;;  %v845_v51 = vsel %vm816_vm2, %v784_v39, %v786_v38 }
  0xba   : > { %vm394_vm3 = vcmp.ne.s32.totalorder %v3365_v36, 127 }
  0xbc   : > { %573 = vmatmul.f32.gmra.mxu1 %v3192_v40  ;;  %v3370_v40 = vperm.slane %v952_v33, 1 }
  0xbd   : > { %v3357_v32 = vpop.f32.mrf.mxu2 }
  0xbe   : > { %v958_v49 = vmul.f32 %v3370_v40, %v3270_v1 }
  0xc1   : > { %v3323_v19 = vpop.f32.mrf.mxu0  ;;  %v3325_v20 = vpop.f32.mrf.mxu1 }
  0xc4   : > { %576 = vmatmul.f32.gmra.mxu1 %v3222_v50 }
  0xc5   : > { %v3385_v48 = vpop.f32.mrf.mxu2 }
  0xc6   : > { %4257 = vst [vmem:[#allocation4_spill] sm:$0xff] %v3385_v48 }
  0xc9   : > { %v3341_v25 = vpop.f32.mrf.mxu0  ;;  %v3343_v26 = vpop.f32.mrf.mxu1 }
  0xcc   : > { %579 = vmatmul.f32.gmra.mxu1 %v3246_v58 }
  0xcd   : > { %v615_v11 = vpop.f32.mrf.mxu2 }
  0xce   : > { %v976_v11 = vmul.f32 %v3370_v40, %v3272_v2 }
  0xd1   : > { %v3348_v28 = vpop.f32.mrf.mxu0  ;;  %v3350_v29 = vpop.f32.mrf.mxu1 }
  0xd2   : > { %v683_v44 = vrot.slane %v3350_v29, 7 }
  0xd4   : > { %582 = vmatmul.f32.gmra.mxu1 %v3252_v60  ;;  %v1028_v60 = vmul.f32 %v3405_v54, %v845_v51 }
  0xd5   : > { %v618_v43 = vpop.f32.mrf.mxu2 }
  0xd9   : > { %v3372_v41 = vpop.f32.mrf.mxu0  ;;  %v3374_v42 = vpop.f32.mrf.mxu1 }
  0xda   : > { %v685_v45 = vrot.slane %v3374_v42, 7  ;;  %v814_v46 = vrot.slane %v3374_v42, 1  ;;  %v988_v56 = vmul.f32 %v3370_v40, %v3374_v42 }
  0xdc   : > { %v718_v50 = vsel %vm687_vm1, %v685_v45, %v655_v37  ;;  %585 = vmatmul.f32.gmra.mxu1 %v3258_v62  ;;  %v688_v52 = vsel %vm687_vm1, %v683_v44, %v685_v45  ;;  %v847_v55 = vsel %vm816_vm2, %v814_v46, %v784_v39  ;;  %v667_v62 = vrot.slane %v3372_v41, 7 }
  0xdd   : > { %v752_v53 = vsel %vm363_vm0, %v718_v50, 0.0  ;;  %v911_v58 = vsel %vm394_vm3, %v847_v55, 0.0  ;;  %v950_v59 = vmul.f32 %v3383_v47, %v688_v52  ;;  %v802_v45 = vrot.slane %v3272_v2, 1 }
  0xde   : > { %v920_v57 = vmul.f32 %v3383_v47, %v752_v53  ;;  %v1058_v3 = vmul.f32 %v3405_v54, %v911_v58  ;;  %v673_v53 = vrot.slane %v3272_v2, 7 }
  0xdf   : > { %v1020_v0 = vadd.f32 %v988_v56, %v950_v59 }
  0xe0   : > { %v990_v63 = vadd.f32 %v958_v49, %v920_v57 }
  0xe1   : > { %v3421_v4 = vpop.f32.mrf.mxu0  ;;  %v3423_v5 = vpop.f32.mrf.mxu1  ;;  %v3432_v15 = vadd.f32 %v1058_v3, %v1020_v0 }
  0xe2   : > { %v669_v6 = vrot.slane %v3421_v4, 7  ;;  %v1060_v9 = vadd.f32 %v1028_v60, %v990_v63  ;;  %v972_v17 = vmul.f32 %v3370_v40, %v3421_v4  ;;  %v798_v22 = vrot.slane %v3421_v4, 1 }
  0xe3   : > { %v804_v63 = vrot.slane %v3289_v8, 1 }
  0xe4   : > { %v704_v12 = vsel %vm687_vm1, %v667_v62, %v669_v6  ;;  %v1098_v16 = vadd.f32 %v3426_v10, %v1060_v9  ;;  %v621_v9 = vpop.f32.mrf.mxu2 }
  0xe5   : > { %v934_v21 = vmul.f32 %v3383_v47, %v704_v12  ;;  %v675_v12 = vrot.slane %v3289_v8, 7  ;;  %v679_v9 = vrot.slane %v3325_v20, 7 }
  0xe6   : > { %v1130_v18 = vmax.f32 %v1098_v16, 0.0  ;;  %v827_v16 = vsel %vm816_vm2, %v802_v45, %v804_v63 }
  0xe7   : > { %v1004_v39 = vadd.f32 %v972_v17, %v934_v21  ;;  %v806_v21 = vrot.slane %v3307_v14, 1 }
  0xe8   : > { %1210 = vmatmul.f32.vlgmr.msrb.gmra.mxu2 %v1130_v18 }
  0xe9   : > { %v3439_v23 = vpop.f32.mrf.mxu0  ;;  %v3441_v24 = vpop.f32.mrf.mxu1 }
  0xea   : > { %v671_v30 = vrot.slane %v3439_v23, 7  ;;  %v800_v33 = vrot.slane %v3439_v23, 1  ;;  %v974_v35 = vmul.f32 %v3370_v40, %v3439_v23 }
  0xec   : > { %v831_v49 = vsel %vm816_vm2, %v798_v22, %v800_v33  ;;  %v702_v50 = vsel %vm687_vm1, %v669_v6, %v671_v30  ;;  %v829_v55 = vsel %vm816_vm2, %v800_v33, %v802_v45  ;;  %v700_v58 = vsel %vm687_vm1, %v671_v30, %v673_v53 }
  0xed   : > { %v1042_v51 = vmul.f32 %v3405_v54, %v831_v49  ;;  %v936_v52 = vmul.f32 %v3383_v47, %v702_v50  ;;  %v1044_v61 = vmul.f32 %v3405_v54, %v829_v55  ;;  %v938_v6 = vmul.f32 %v3383_v47, %v700_v58  ;;  %v624_v49 = vpop.f32.mrf.mxu2 }
  0xee   : > { %v1046_v33 = vmul.f32 %v3405_v54, %v827_v16  ;;  %v825_v50 = vsel %vm816_vm2, %v804_v63, %v806_v21 }
  0xef   : > { %v1074_v56 = vadd.f32 %v1042_v51, %v1004_v39  ;;  %v1006_v57 = vadd.f32 %v974_v35, %v936_v52  ;;  %v1008_v18 = vadd.f32 %v976_v11, %v938_v6  ;;  %v698_v35 = vsel %vm687_vm1, %v673_v53, %v675_v12 }
  0xf0   : > { %v940_v45 = vmul.f32 %v3383_v47, %v698_v35  ;;  %v677_v51 = vrot.slane %v3307_v14, 7  ;;  %v978_v52 = vmul.f32 %v3370_v40, %v3289_v8  ;;  %v808_v53 = vrot.slane %v3325_v20, 1 }
  0xf1   : > { %v3461_v59 = vpop.f32.mrf.mxu1  ;;  %v1112_v60 = vadd.f32 %v3426_v10, %v1074_v56  ;;  %v1076_v3 = vadd.f32 %v1044_v61, %v1006_v57  ;;  %v1078_v43 = vadd.f32 %v1046_v33, %v1008_v18  ;;  %v1048_v56 = vmul.f32 %v3405_v54, %v825_v50 }
  0xf2   : > { %v1010_v58 = vadd.f32 %v978_v52, %v940_v45  ;;  %v980_v11 = vmul.f32 %v3370_v40, %v3307_v14  ;;  %v681_v45 = vrot.slane %v3343_v26, 7  ;;  %v982_v52 = vmul.f32 %v3370_v40, %v3325_v20 }
  0xf3   : > { %v1144_v0 = vmax.f32 %v1112_v60, 0.0  ;;  %v1114_v17 = vadd.f32 %v3426_v10, %v1076_v3  ;;  %v1116_v55 = vadd.f32 %v3426_v10, %v1078_v43  ;;  %v696_v60 = vsel %vm687_vm1, %v675_v12, %v677_v51 }
  0xf4   : > { %v1080_v63 = vadd.f32 %v1048_v56, %v1010_v58  ;;  %v823_v3 = vsel %vm816_vm2, %v806_v21, %v808_v53  ;;  %v942_v6 = vmul.f32 %v3383_v47, %v696_v60  ;;  %v810_v12 = vrot.slane %v3343_v26, 1 }
  0xf5   : > { %1231 = vmatmul.f32.vlgmr.msra.gmra.mxu3 %v1144_v0  ;;  %v1146_v39 = vmax.f32 %v1114_v17, 0.0  ;;  %v1148_v61 = vmax.f32 %v1116_v55, 0.0  ;;  %v627_v0 = vpop.f32.mrf.mxu2  ;;  %v1050_v17 = vmul.f32 %v3405_v54, %v823_v3  ;;  %v694_v21 = vsel %vm687_vm1, %v677_v51, %v679_v9 }
  0xf6   : > { %v1118_v16 = vadd.f32 %v3426_v10, %v1080_v63  ;;  %v1012_v33 = vadd.f32 %v980_v11, %v942_v6  ;;  %v821_v49 = vsel %vm816_vm2, %v808_v53, %v810_v12  ;;  %v944_v50 = vmul.f32 %v3383_v47, %v694_v21 }
  0xf7   : > { %v1052_v56 = vmul.f32 %v3405_v54, %v821_v49  ;;  %v812_v51 = vrot.slane %v3350_v29, 1  ;;  %v692_v53 = vsel %vm687_vm1, %v679_v9, %v681_v45  ;;  %v984_v11 = vmul.f32 %v3370_v40, %v3343_v26 }
  0xf8   : > { %v1150_v35 = vmax.f32 %v1118_v16, 0.0  ;;  %v1014_v60 = vadd.f32 %v982_v52, %v944_v50  ;;  %v946_v6 = vmul.f32 %v3383_v47, %v692_v53  ;;  %v690_v9 = vsel %vm687_vm1, %v681_v45, %v683_v44 }
  0xf9   : > { %v3474_v30 = vpop.f32.mrf.mxu1  ;;  %v819_v3 = vsel %vm816_vm2, %v810_v12, %v812_v51  ;;  %v948_v49 = vmul.f32 %v3383_v47, %v690_v9  ;;  %v986_v50 = vmul.f32 %v3370_v40, %v3350_v29  ;;  %v788_v9 = vrot.slane %v3305_v13, 1 }
  0xfa   : > { %v1084_v63 = vadd.f32 %v1052_v56, %v1014_v60  ;;  %v1016_v21 = vadd.f32 %v984_v11, %v946_v6  ;;  %v1191_v6 = vld [vmem:[%s4248_s3 + $0xe8] sm:$0xff]  ;;  %v1190_v11 = vld [vmem:[%s4248_s3 + $0xe0] sm:$0xff] }
  0xfb   : > { %v1018_v44 = vadd.f32 %v986_v50, %v948_v49  ;;  %v1187_v49 = vld [vmem:[%s4248_s3 + $0xc8] sm:$0xff] }
  0xfc   : > { %v1122_v16 = vadd.f32 %v3426_v10, %v1084_v63  ;;  %v1192_v63 = vld [vmem:[%s4248_s3 + $0xf0] sm:$0xff] }
  0xfd   : > { %1234 = vmatmul.f32.gmra.mxu3 %v1146_v39  ;;  %v1082_v39 = vadd.f32 %v1050_v17, %v1012_v33  ;;  %v630_v43 = vpop.f32.mrf.mxu2  ;;  %v1054_v17 = vmul.f32 %v3405_v54, %v819_v3 }
  0xfe   : > { %v817_v43 = vsel %vm816_vm2, %v812_v51, %v814_v46  ;;  %v1193_v51 = vld [vmem:[%s4248_s3 + $0xf8] sm:$0xff] }
  0xff   : > { %v1120_v55 = vadd.f32 %v3426_v10, %v1082_v39  ;;  %v1086_v12 = vadd.f32 %v1054_v17, %v1016_v21  ;;  %1259 = vmatpush.msrb.mxu0 %v1193_v51  ;;  %v657_v17 = vrot.slane %v3287_v7, 7  ;;  %v790_v51 = vrot.slane %v3323_v19, 1 }
 0x101   : > { %v3488_v57 = vpop.f32.mrf.mxu1  ;;  %v1124_v52 = vadd.f32 %v3426_v10, %v1086_v12  ;;  %1260 = vmatpush.msrb.mxu0 %v1192_v63  ;;  %v1188_v12 = vld [vmem:[%s4248_s3 + $0xd0] sm:$0xff]  ;;  %v716_v50 = vsel %vm687_vm1, %v655_v37, %v657_v17  ;;  %v962_v63 = vmul.f32 %v3370_v40, %v3305_v13 }
 0x103   : > { %v1156_v45 = vmax.f32 %v1124_v52, 0.0  ;;  %1261 = vmatpush.msrb.mxu0 %v1191_v6  ;;  %v922_v52 = vmul.f32 %v3383_v47, %v716_v50 }
 0x105   : > { %1237 = vmatmul.f32.gmra.mxu3 %v1148_v61  ;;  %v1152_v61 = vmax.f32 %v1120_v55, 0.0  ;;  %v633_v0 = vpop.f32.mrf.mxu2  ;;  %v1056_v55 = vmul.f32 %v3405_v54, %v817_v43  ;;  %1262 = vmatpush.msrb.mxu0 %v1190_v11  ;;  %v1184_v11 = vld [vmem:[%s4248_s3 + $0xb0] sm:$0xff] }
 0x107   : > { %v1088_v60 = vadd.f32 %v1056_v55, %v1018_v44  ;;  %v1186_v55 = vld [vmem:[%s4248_s3 + $0xc0] sm:$0xff]  ;;  %v843_v44 = vsel %vm816_vm2, %v786_v38, %v788_v9 }
 0x109   : > { %v3501_v18 = vpop.f32.mrf.mxu1 }
 0x10d   : > { %1240 = vmatmul.f32.gmra.mxu3 %v1150_v35  ;;  %v1154_v35 = vmax.f32 %v1122_v16, 0.0  ;;  %v636_v39 = vpop.f32.mrf.mxu2  ;;  %v1128_v16 = vadd.f32 %v3426_v10, %v3432_v15 }
 0x10e   : > { %v960_v39 = vmul.f32 %v3370_v40, %v3287_v7 }
 0x10f   : > { %v1160_v15 = vmax.f32 %v1128_v16, 0.0 }
 0x111   : > { %v3514_v58 = vpop.f32.mrf.mxu1 }
 0x115   : > { %1243 = vmatmul.f32.gmra.mxu3 %v1152_v61  ;;  %v639_v53 = vpop.f32.mrf.mxu2  ;;  %v1126_v61 = vadd.f32 %v3426_v10, %v1088_v60  ;;  %v1030_v60 = vmul.f32 %v3405_v54, %v843_v44  ;;  %v964_v44 = vmul.f32 %v3370_v40, %v3323_v19 }
 0x116   : > { %v659_v53 = vrot.slane %v3305_v13, 7 }
 0x117   : > { %v1158_v0 = vmax.f32 %v1126_v61, 0.0 }
 0x118   : > { %v714_v6 = vsel %vm687_vm1, %v657_v17, %v659_v53  ;;  %v1182_v17 = vld [vmem:[%s4248_s3 + $0xa0] sm:$0xff] }
 0x119   : > { %v3525_v33 = vpop.f32.mrf.mxu1 }
 0x11d   : > { %1246 = vmatmul.f32.gmra.mxu3 %v1154_v35  ;;  %v642_v3 = vpop.f32.mrf.mxu2  ;;  %v1189_v35 = vld [vmem:[%s4248_s3 + $0xd8] sm:$0xff] }
 0x11e   : > { %1263 = vmatpush.msrb.mxu0 %v1189_v35  ;;  %v924_v35 = vmul.f32 %v3383_v47, %v714_v6  ;;  %v1178_v6 = vld [vmem:[%s4248_s3 + $0x80] sm:$0xff] }
 0x120   : > { %1264 = vmatpush.msrb.mxu0 %v1188_v12  ;;  %v841_v12 = vsel %vm816_vm2, %v788_v9, %v790_v51  ;;  %v1181_v9 = vld [vmem:[%s4248_s3 + $0x98] sm:$0xff] }
 0x121   : > { %v3540_v56 = vpop.f32.mrf.mxu1 }
 0x122   : > { %1265 = vmatpush.msrb.mxu0 %v1187_v49  ;;  %v661_v49 = vrot.slane %v3323_v19, 7 }
 0x124   : > { %1266 = vmatpush.msrb.mxu0 %v1186_v55  ;;  %v792_v55 = vrot.slane %v3341_v25, 1 }
 0x125   : > { %1249 = vmatmul.f32.gmra.mxu3 %v1156_v45  ;;  %v645_v43 = vpop.f32.mrf.mxu2  ;;  %v992_v45 = vadd.f32 %v960_v39, %v922_v52  ;;  %v1183_v39 = vld [vmem:[%s4248_s3 + $0xa8] sm:$0xff] }
 0x126   : > { %v1032_v43 = vmul.f32 %v3405_v54, %v841_v12 }
 0x127   : > { %v1062_v61 = vadd.f32 %v1030_v60, %v992_v45  ;;  %v1180_v45 = vld [vmem:[%s4248_s3 + $0x90] sm:$0xff] }
 0x129   : > { %v3543_v46 = vpop.f32.mrf.mxu1  ;;  %v1100_v38 = vadd.f32 %v3426_v10, %v1062_v61  ;;  %v712_v61 = vsel %vm687_vm1, %v659_v53, %v661_v49  ;;  %v663_v53 = vrot.slane %v3341_v25, 7 }
 0x12b   : > { %v1132_v16 = vmax.f32 %v1100_v38, 0.0  ;;  %v926_v38 = vmul.f32 %v3383_v47, %v712_v61 }
 0x12d   : > { %1252 = vmatmul.f32.gmra.mxu3 %v1158_v0  ;;  %v1185_v0 = vld [vmem:[%s4248_s3 + $0xb8] sm:$0xff]  ;;  %v648_v3 = vpop.f32.mrf.mxu2  ;;  %1213 = vmatmul.f32.gmra.mxu2 %v1132_v16 }
 0x12e   : > { %1267 = vmatpush.msrb.mxu0 %v1185_v0  ;;  %v1179_v0 = vld [vmem:[%s4248_s3 + $0x88] sm:$0xff]  ;;  %v839_v3 = vsel %vm816_vm2, %v790_v51, %v792_v55  ;;  %v966_v51 = vmul.f32 %v3370_v40, %v3341_v25 }
 0x12f   : > { %v1034_v16 = vmul.f32 %v3405_v54, %v839_v3 }
 0x130   : > { %1268 = vmatpush.msrb.mxu0 %v1184_v11  ;;  %v996_v11 = vadd.f32 %v964_v44, %v926_v38 }
 0x131   : > { %v3560_v21 = vpop.f32.mrf.mxu1 }
 0x132   : > { %1269 = vmatpush.msrb.mxu0 %v1183_v39  ;;  %v1066_v12 = vadd.f32 %v1034_v16, %v996_v11  ;;  %v794_v39 = vrot.slane %v3348_v28, 1  ;;  %v953_v11 = vperm.slane %v3355_v31, 5 }
 0x134   : > { %1270 = vmatpush.msrb.mxu0 %v1182_v17  ;;  %v1104_v17 = vadd.f32 %v3426_v10, %v1066_v12  ;;  %v915_v12 = vperm.slane %v3355_v31, 4 }
 0x135   : > { %1255 = vmatmul.f32.gmra.mxu3 %v1160_v15  ;;  %v994_v15 = vadd.f32 %v962_v63, %v924_v35 }
 0x136   : > { %1271 = vmatpush.msrb.mxu0 %v1181_v9 }
 0x137   : > { %v1064_v52 = vadd.f32 %v1032_v43, %v994_v15  ;;  %v710_v15 = vsel %vm687_vm1, %v661_v49, %v663_v53  ;;  %v1136_v43 = vmax.f32 %v1104_v17, 0.0  ;;  %v968_v49 = vmul.f32 %v3370_v40, %v3348_v28 }
 0x138   : > { %1272 = vmatpush.msrb.mxu0 %v1180_v45  ;;  %v928_v9 = vmul.f32 %v3383_v47, %v710_v15  ;;  %v787_v15 = vrot.slane %v3441_v24, 1 }
 0x139   : > { %v3588_v37 = vpop.f32.mrf.mxu1  ;;  %v1102_v60 = vadd.f32 %v3426_v10, %v1064_v52  ;;  %v837_v52 = vsel %vm816_vm2, %v792_v55, %v794_v39 }
 0x13a   : > { %1273 = vmatpush.msrb.mxu0 %v1179_v0  ;;  %v998_v44 = vadd.f32 %v966_v51, %v928_v9  ;;  %v1036_v45 = vmul.f32 %v3405_v54, %v837_v52  ;;  %v796_v0 = vrot.slane %v3372_v41, 1 }
 0x13b   : > { %v1134_v63 = vmax.f32 %v1102_v60, 0.0  ;;  %v665_v60 = vrot.slane %v3348_v28, 7 }
 0x13c   : > { %1274 = vmatpush.msrb.mxu0 %v1178_v6  ;;  %v835_v16 = vsel %vm816_vm2, %v794_v39, %v796_v0  ;;  %v3672_v39 = vperm.slane %v953_v11, 1 }
 0x13d   : > { %1216 = vmatmul.f32.gmra.mxu2 %v1134_v63  ;;  %v1068_v63 = vadd.f32 %v1036_v45, %v998_v44  ;;  %v708_v3 = vsel %vm687_vm1, %v663_v53, %v665_v60  ;;  %v1038_v17 = vmul.f32 %v3405_v54, %v835_v16  ;;  %v658_v53 = vrot.slane %v3441_v24, 7 }
 0x13e   : > { %v930_v6 = vmul.f32 %v3383_v47, %v708_v3  ;;  %v656_v44 = vrot.slane %v3423_v5, 7  ;;  %v4255_v45 = vrot.slane %v3423_v5, 1  ;;  %v3678_v3 = vperm.slane %v915_v12, 0 }
 0x13f   : > { %v1106_v38 = vadd.f32 %v3426_v10, %v1068_v63  ;;  %v961_v27 = vmul.f32 %v3672_v39, %v3441_v24 }
 0x140   : > { %v1000_v51 = vadd.f32 %v968_v49, %v930_v6  ;;  %v970_v49 = vmul.f32 %v3370_v40, %v3372_v41  ;;  %v846_v11 = vsel %vm816_vm2, %v4255_v45, %v787_v15  ;;  %v706_v40 = vsel %vm687_vm1, %v665_v60, %v667_v62 }
 0x141   : > { %v3613_v50 = vpop.f32.mrf.mxu1  ;;  %v1138_v55 = vmax.f32 %v1106_v38, 0.0  ;;  %v789_v38 = vrot.slane %v3461_v59, 1  ;;  %v1093_v45 = vperm.slane %v3355_v31, 7  ;;  %v833_v62 = vsel %vm816_vm2, %v796_v0, %v798_v22 }
 0x142   : > { %v1070_v52 = vadd.f32 %v1038_v17, %v1000_v51  ;;  %v717_v51 = vsel %vm687_vm1, %v656_v44, %v658_v53 }
 0x143   : > { %v844_v60 = vsel %vm816_vm2, %v787_v15, %v789_v38  ;;  %v3716_v22 = vperm.slane %v1093_v45, 3  ;;  %v791_v15 = vrot.slane %v3474_v30, 1 }
 0x145   : > { %1219 = vmatmul.f32.gmra.mxu2 %v1136_v43  ;;  %v1023_v43 = vperm.slane %v3355_v31, 6 }
 0x147   : > { %v3689_v16 = vperm.slane %v1023_v43, 2 }
 0x149   : > { %v3638_v35 = vpop.f32.mrf.mxu1  ;;  %v1031_v0 = vmul.f32 %v3689_v16, %v844_v60 }
 0x14d   : > { %1222 = vmatmul.f32.gmra.mxu2 %v1138_v55  ;;  %v1108_v55 = vadd.f32 %v3426_v10, %v1070_v52  ;;  %v932_v52 = vmul.f32 %v3383_v47, %v706_v40  ;;  %v923_v40 = vmul.f32 %v3678_v3, %v717_v51 }
 0x14f   : > { %v1140_v17 = vmax.f32 %v1108_v55, 0.0  ;;  %v1040_v55 = vmul.f32 %v3405_v54, %v833_v62  ;;  %v662_v62 = vrot.slane %v3474_v30, 7 }
 0x151   : > { %v3651_v61 = vpop.f32.mrf.mxu1 }
 0x155   : > { %1225 = vmatmul.f32.gmra.mxu2 %v1140_v17 }
 0x159   : > { %v3668_v9 = vpop.f32.mrf.mxu1 }
 0x15a   : > { %v4254_v63 = vrot.slane %v3668_v9, 7 }
 0x15c   : > { %v719_v6 = vsel %vm687_vm1, %v4254_v63, %v656_v44  ;;  %v959_v63 = vmul.f32 %v3672_v39, %v3423_v5  ;;  %v1002_v44 = vadd.f32 %v970_v49, %v932_v52  ;;  %v993_v49 = vadd.f32 %v961_v27, %v923_v40 }
 0x15d   : > { %v753_v12 = vsel %vm363_vm0, %v719_v6, 0.0  ;;  %v1029_v6 = vmul.f32 %v3689_v16, %v846_v11  ;;  %v664_v40 = vrot.slane %v3488_v57, 7 }
 0x15e   : > { %v921_v43 = vmul.f32 %v3678_v3, %v753_v12  ;;  %v660_v12 = vrot.slane %v3461_v59, 7  ;;  %v1072_v31 = vadd.f32 %v1040_v55, %v1002_v44  ;;  %v1063_v52 = vadd.f32 %v1031_v0, %v993_v49 }
 0x15f   : > { %v711_v49 = vsel %vm687_vm1, %v662_v62, %v664_v40 }
 0x160   : > { %v991_v47 = vadd.f32 %v959_v63, %v921_v43  ;;  %v1110_v54 = vadd.f32 %v3426_v10, %v1072_v31  ;;  %v715_v11 = vsel %vm687_vm1, %v658_v53, %v660_v12  ;;  %v842_v43 = vsel %vm816_vm2, %v789_v38, %v791_v15 }
 0x161   : > { %v925_v45 = vmul.f32 %v3678_v3, %v715_v11  ;;  %v963_v10 = vmul.f32 %v3672_v39, %v3461_v59  ;;  %v1101_v27 = vadd.f32 %v3716_v22, %v1063_v52  ;;  %v793_v53 = vrot.slane %v3488_v57, 1 }
 0x162   : > { %v1061_v48 = vadd.f32 %v1029_v6, %v991_v47  ;;  %v1142_v51 = vmax.f32 %v1110_v54, 0.0  ;;  %v713_v44 = vsel %vm687_vm1, %v660_v12, %v662_v62  ;;  %v965_v31 = vmul.f32 %v3672_v39, %v3474_v30 }
 0x163   : > { %v995_v60 = vadd.f32 %v963_v10, %v925_v45  ;;  %v1133_v38 = vmax.f32 %v1101_v27, 0.0  ;;  %v840_v47 = vsel %vm816_vm2, %v791_v15, %v793_v53  ;;  %v927_v6 = vmul.f32 %v3678_v3, %v713_v44 }
 0x164   : > { %v1099_v63 = vadd.f32 %v3716_v22, %v1061_v48  ;;  %1228 = vmatmul.f32.gmra.mxu2 %v1142_v51  ;;  %v1033_v48 = vmul.f32 %v3689_v16, %v842_v43  ;;  %v1035_v54 = vmul.f32 %v3689_v16, %v840_v47  ;;  %v666_v52 = vrot.slane %v3501_v18, 7 }
 0x165   : > { %v997_v12 = vadd.f32 %v965_v31, %v927_v6  ;;  %v967_v43 = vmul.f32 %v3672_v39, %v3488_v57  ;;  %v797_v27 = vrot.slane %v3514_v58, 1  ;;  %v969_v47 = vmul.f32 %v3672_v39, %v3501_v18 }
 0x166   : > { %v1131_v17 = vmax.f32 %v1099_v63, 0.0  ;;  %v1065_v55 = vadd.f32 %v1033_v48, %v995_v60  ;;  %v795_v63 = vrot.slane %v3501_v18, 1  ;;  %v709_v48 = vsel %vm687_vm1, %v664_v40, %v666_v52 }
 0x167   : > { %v1067_v15 = vadd.f32 %v1035_v54, %v997_v12 }
 0x168   : > { %1275 = vmatmul.f32.vlgmr.msrb.gmra.mxu0 %v1131_v17  ;;  %v1103_v0 = vadd.f32 %v3716_v22, %v1065_v55  ;;  %v838_v51 = vsel %vm816_vm2, %v793_v53, %v795_v63  ;;  %v929_v17 = vmul.f32 %v3678_v3, %v711_v49  ;;  %v836_v44 = vsel %vm816_vm2, %v795_v63, %v797_v27 }
 0x169   : > { %v1105_v45 = vadd.f32 %v3716_v22, %v1067_v15  ;;  %v1037_v10 = vmul.f32 %v3689_v16, %v838_v51  ;;  %v668_v55 = vrot.slane %v3514_v58, 7  ;;  %v1039_v31 = vmul.f32 %v3689_v16, %v836_v44 }
 0x16a   : > { %v1135_v11 = vmax.f32 %v1103_v0, 0.0  ;;  %v999_v62 = vadd.f32 %v967_v43, %v929_v17  ;;  %v799_v0 = vrot.slane %v3525_v33, 1  ;;  %v670_v15 = vrot.slane %v3525_v33, 7 }
 0x16b   : > { %v1137_v60 = vmax.f32 %v1105_v45, 0.0  ;;  %v707_v54 = vsel %vm687_vm1, %v666_v52, %v668_v55  ;;  %v971_v51 = vmul.f32 %v3672_v39, %v3514_v58  ;;  %v801_v45 = vrot.slane %v3540_v56, 1 }
 0x16c   : > { %v1069_v53 = vadd.f32 %v1037_v10, %v999_v62  ;;  %v834_v49 = vsel %vm816_vm2, %v797_v27, %v799_v0  ;;  %v705_v10 = vsel %vm687_vm1, %v668_v55, %v670_v15  ;;  %v973_v44 = vmul.f32 %v3672_v39, %v3525_v33 }
 0x16d   : > { %v1041_v43 = vmul.f32 %v3689_v16, %v834_v49  ;;  %v975_v49 = vmul.f32 %v3672_v39, %v3540_v56 }
 0x16e   : > { %v1107_v6 = vadd.f32 %v3716_v22, %v1069_v53  ;;  %v672_v53 = vrot.slane %v3540_v56, 7 }
 0x170   : > { %1278 = vmatmul.f32.gmra.mxu0 %v1133_v38  ;;  %v931_v38 = vmul.f32 %v3678_v3, %v709_v48  ;;  %v1139_v12 = vmax.f32 %v1107_v6, 0.0  ;;  %v832_v48 = vsel %vm816_vm2, %v799_v0, %v801_v45  ;;  %v803_v6 = vrot.slane %v3543_v46, 1 }
 0x172   : > { %v1001_v40 = vadd.f32 %v969_v47, %v931_v38  ;;  %v1043_v47 = vmul.f32 %v3689_v16, %v832_v48  ;;  %v977_v48 = vmul.f32 %v3672_v39, %v3543_v46 }
 0x174   : > { %v1071_v63 = vadd.f32 %v1039_v31, %v1001_v40  ;;  %v703_v31 = vsel %vm687_vm1, %v670_v15, %v672_v53 }
 0x176   : > { %v1109_v17 = vadd.f32 %v3716_v22, %v1071_v63  ;;  %v674_v63 = vrot.slane %v3543_v46, 7 }
 0x178   : > { %1281 = vmatmul.f32.gmra.mxu0 %v1135_v11  ;;  %v933_v11 = vmul.f32 %v3678_v3, %v707_v54  ;;  %v1141_v62 = vmax.f32 %v1109_v17, 0.0  ;;  %v830_v54 = vsel %vm816_vm2, %v801_v45, %v803_v6  ;;  %v805_v17 = vrot.slane %v3560_v21, 1 }
 0x17a   : > { %v1003_v52 = vadd.f32 %v971_v51, %v933_v11  ;;  %v1045_v51 = vmul.f32 %v3689_v16, %v830_v54  ;;  %v979_v54 = vmul.f32 %v3672_v39, %v3560_v21 }
 0x17c   : > { %v1073_v27 = vadd.f32 %v1041_v43, %v1003_v52  ;;  %v701_v43 = vsel %vm687_vm1, %v672_v53, %v674_v63 }
 0x17e   : > { %v1111_v38 = vadd.f32 %v3716_v22, %v1073_v27  ;;  %v676_v27 = vrot.slane %v3560_v21, 7 }
 0x180   : > { %1284 = vmatmul.f32.gmra.mxu0 %v1137_v60  ;;  %v935_v60 = vmul.f32 %v3678_v3, %v705_v10  ;;  %v1143_v40 = vmax.f32 %v1111_v38, 0.0  ;;  %v828_v10 = vsel %vm816_vm2, %v803_v6, %v805_v17  ;;  %v807_v38 = vrot.slane %v3588_v37, 1 }
 0x182   : > { %v1005_v55 = vadd.f32 %v973_v44, %v935_v60  ;;  %v1047_v44 = vmul.f32 %v3689_v16, %v828_v10  ;;  %v981_v10 = vmul.f32 %v3672_v39, %v3588_v37 }
 0x184   : > { %v1075_v0 = vadd.f32 %v1043_v47, %v1005_v55  ;;  %v699_v47 = vsel %vm687_vm1, %v674_v63, %v676_v27 }
 0x186   : > { %v1113_v11 = vadd.f32 %v3716_v22, %v1075_v0  ;;  %v678_v0 = vrot.slane %v3588_v37, 7 }
 0x188   : > { %1287 = vmatmul.f32.gmra.mxu0 %v1139_v12  ;;  %v937_v12 = vmul.f32 %v3678_v3, %v703_v31  ;;  %v1145_v52 = vmax.f32 %v1113_v11, 0.0  ;;  %v826_v31 = vsel %vm816_vm2, %v805_v17, %v807_v38  ;;  %v809_v11 = vrot.slane %v3613_v50, 1 }
 0x18a   : > { %v1007_v15 = vadd.f32 %v975_v49, %v937_v12  ;;  %v1049_v49 = vmul.f32 %v3689_v16, %v826_v31  ;;  %v983_v31 = vmul.f32 %v3672_v39, %v3613_v50 }
 0x18c   : > { %v1077_v45 = vadd.f32 %v1045_v51, %v1007_v15  ;;  %v697_v51 = vsel %vm687_vm1, %v676_v27, %v678_v0 }
 0x18e   : > { %v1115_v60 = vadd.f32 %v3716_v22, %v1077_v45  ;;  %v680_v45 = vrot.slane %v3613_v50, 7 }
 0x190   : > { %1290 = vmatmul.f32.gmra.mxu0 %v1141_v62  ;;  %v939_v62 = vmul.f32 %v3678_v3, %v701_v43  ;;  %v1147_v55 = vmax.f32 %v1115_v60, 0.0  ;;  %v824_v43 = vsel %vm816_vm2, %v807_v38, %v809_v11  ;;  %v811_v60 = vrot.slane %v3638_v35, 1 }
 0x192   : > { %v1009_v53 = vadd.f32 %v977_v48, %v939_v62  ;;  %v1051_v48 = vmul.f32 %v3689_v16, %v824_v43  ;;  %v985_v43 = vmul.f32 %v3672_v39, %v3638_v35 }
 0x194   : > { %v1079_v6 = vadd.f32 %v1047_v44, %v1009_v53  ;;  %v695_v44 = vsel %vm687_vm1, %v678_v0, %v680_v45 }
 0x196   : > { %v1117_v12 = vadd.f32 %v3716_v22, %v1079_v6  ;;  %v682_v6 = vrot.slane %v3638_v35, 7 }
 0x198   : > { %1293 = vmatmul.f32.gmra.mxu0 %v1143_v40  ;;  %v941_v40 = vmul.f32 %v3678_v3, %v699_v47  ;;  %v1149_v15 = vmax.f32 %v1117_v12, 0.0  ;;  %v822_v47 = vsel %vm816_vm2, %v809_v11, %v811_v60  ;;  %v813_v12 = vrot.slane %v3651_v61, 1 }
 0x19a   : > { %v1011_v63 = vadd.f32 %v979_v54, %v941_v40  ;;  %v1053_v54 = vmul.f32 %v3689_v16, %v822_v47 }
 0x19c   : > { %v1081_v17 = vadd.f32 %v1049_v49, %v1011_v63  ;;  %v693_v49 = vsel %vm687_vm1, %v680_v45, %v682_v6 }
 0x19e   : > { %v1119_v62 = vadd.f32 %v3716_v22, %v1081_v17  ;;  %v684_v17 = vrot.slane %v3651_v61, 7 }
 0x1a0   : > { %1296 = vmatmul.f32.gmra.mxu0 %v1145_v52  ;;  %v943_v52 = vmul.f32 %v3678_v3, %v697_v51  ;;  %v1151_v53 = vmax.f32 %v1119_v62, 0.0  ;;  %v820_v51 = vsel %vm816_vm2, %v811_v60, %v813_v12  ;;  %v815_v62 = vrot.slane %v3668_v9, 1 }
 0x1a2   : > { %v1013_v27 = vadd.f32 %v981_v10, %v943_v52  ;;  %v1055_v10 = vmul.f32 %v3689_v16, %v820_v51  ;;  %v989_v51 = vmul.f32 %v3672_v39, %v3668_v9 }
 0x1a4   : > { %v1083_v38 = vadd.f32 %v1051_v48, %v1013_v27  ;;  %v691_v48 = vsel %vm687_vm1, %v682_v6, %v684_v17 }
 0x1a6   : > { %v1121_v40 = vadd.f32 %v3716_v22, %v1083_v38  ;;  %v987_v38 = vmul.f32 %v3672_v39, %v3651_v61  ;;  %v2977_v39 = vmov 1  }
 0x1a7   : > { %2853 = vset.pattern.permute.xlu0 %v2977_v39  ;;  %2855 = vset.pattern.permute.xlu1 %v2977_v39 }
 0x1a8   : > { %1299 = vmatmul.f32.gmra.mxu0 %v1147_v55  ;;  %v945_v55 = vmul.f32 %v3678_v3, %v695_v44  ;;  %v1153_v63 = vmax.f32 %v1121_v40, 0.0  ;;  %v818_v44 = vsel %vm816_vm2, %v813_v12, %v815_v62  ;;  %v4259_v40 = vrot.slane %v3423_v5, 1 }
 0x1aa   : > { %v1015_v0 = vadd.f32 %v983_v31, %v945_v55  ;;  %v1057_v55 = vmul.f32 %v3689_v16, %v818_v44  ;;  %v4258_v31 = vrot.slane %v3668_v9, 7 }
 0x1ac   : > { %v1085_v11 = vadd.f32 %v1053_v54, %v1015_v0  ;;  %v689_v6 = vsel %vm687_vm1, %v684_v17, %v4258_v31  ;;  %v848_v54 = vsel %vm816_vm2, %v815_v62, %v4259_v40 }
 0x1ad   : > { %v951_v0 = vmul.f32 %v3678_v3, %v689_v6 }
 0x1ae   : > { %v1123_v52 = vadd.f32 %v3716_v22, %v1085_v11  ;;  %v912_v11 = vsel %vm394_vm3, %v848_v54, 0.0 }
 0x1af   : > { %v1021_v17 = vadd.f32 %v989_v51, %v951_v0 }
 0x1b0   : > { %1302 = vmatmul.f32.gmra.mxu0 %v1149_v15  ;;  %v947_v15 = vmul.f32 %v3678_v3, %v693_v49  ;;  %v1155_v27 = vmax.f32 %v1123_v52, 0.0  ;;  %v1059_v52 = vmul.f32 %v3689_v16, %v912_v11 }
 0x1b2   : > { %v1017_v45 = vadd.f32 %v985_v43, %v947_v15  ;;  %v3876_v15 = vpop.f32.mrf.mxu2  ;;  %v1091_v62 = vadd.f32 %v1059_v52, %v1021_v17 }
 0x1b4   : > { %v1087_v60 = vadd.f32 %v1055_v10, %v1017_v45 }
 0x1b6   : > { %v1125_v47 = vadd.f32 %v3716_v22, %v1087_v60 }
 0x1b8   : > { %1305 = vmatmul.f32.gmra.mxu0 %v1151_v53  ;;  %v949_v53 = vmul.f32 %v3678_v3, %v691_v48  ;;  %v1157_v49 = vmax.f32 %v1125_v47, 0.0  ;;  %v1129_v3 = vadd.f32 %v3716_v22, %v1091_v62 }
 0x1ba   : > { %v1019_v12 = vadd.f32 %v987_v38, %v949_v53  ;;  %v1211_v45 = vpop.f32.mrf.mxu2  ;;  %v1161_v48 = vmax.f32 %v1129_v3, 0.0  ;;  %v2978_v53 = vmov 0  }
 0x1bb   : > { %2854 = vset.pattern.permute.xlu2 %v2978_v53 }
 0x1c0   : > { %1308 = vmatmul.f32.gmra.mxu0 %v1153_v63  ;;  %v1089_v63 = vadd.f32 %v1057_v55, %v1019_v12 }
 0x1c2   : > { %v1127_v43 = vadd.f32 %v3716_v22, %v1089_v63 }
 0x1c4   : > { %v1159_v10 = vmax.f32 %v1127_v43, 0.0 }
 0x1c8   : > { %1311 = vmatmul.f32.gmra.mxu0 %v1155_v27  ;;  %v1214_v27 = vpop.f32.mrf.mxu2 }
 0x1d0   : > { %1314 = vmatmul.f32.gmra.mxu0 %v1157_v49  ;;  %v1217_v38 = vpop.f32.mrf.mxu2 }
 0x1d8   : > { %1317 = vmatmul.f32.gmra.mxu0 %v1159_v10  ;;  %v1220_v12 = vpop.f32.mrf.mxu2 }
 0x1e0   : > { %1320 = vmatmul.f32.gmra.mxu0 %v1161_v48 }
 0x1e5   : > { %v1276_v60 = vpop.f32.mrf.mxu0 }
 0x1e6   : > { %v1277_v44 = vadd.f32 %v1276_v60, %v1211_v45 }
 0x1e8   : > { %v2771_v16 = vmul.f32 -1.442695, %v1277_v44 }
 0x1ea   : > { %2879 = vpow2.f32 %v2771_v16  ;;  %v1223_v16 = vpop.f32.mrf.mxu2 }
 0x1ed   : > { %v1279_v47 = vpop.f32.mrf.mxu0 }
 0x1ee   : > { %v1280_v55 = vadd.f32 %v1279_v47, %v1214_v27 }
 0x1f0   : > { %v2880_v22 = vpop.eup %2879  ;;  %v2772_v31 = vmul.f32 -1.442695, %v1280_v55 }
 0x1f1   : > { %v1372_v6 = vadd.f32 1.0, %v2880_v22 }
 0x1f2   : > { %2881 = vpow2.f32 %v2772_v31 }
 0x1f3   : > { %2883 = vrcp.f32 %v1372_v6  ;;  %v1399_v52 = vand.u32 2147483648, %v1372_v6  ;;  %v1397_v3 = vand.u32 2147483647, %v1372_v6  ;;  %vm1393_vm5 = vweird.f32 %v1372_v6 }
 0x1f5   : > { %v1282_v40 = vpop.f32.mrf.mxu0  ;;  %vm1398_vm7 = vcmp.eq.f32.partialorder %v1397_v3, 8.507059e+37  ;;  %v1226_v3 = vpop.f32.mrf.mxu2 }
 0x1f6   : > { %v1283_v54 = vadd.f32 %v1282_v40, %v1217_v38  ;;  %v1400_v38 = vor.u32 1.1754944e-38, %v1399_v52 }
 0x1f8   : > { %v2882_v0 = vpop.eup %2881  ;;  %v2773_v49 = vmul.f32 -1.442695, %v1283_v54 }
 0x1f9   : > { %v2884_v63 = vpop.eup %2883  ;;  %v1373_v11 = vadd.f32 1.0, %v2882_v0 }
 0x1fa   : > { %2885 = vpow2.f32 %v2773_v49  ;;  %v1389_v51 = vmul.f32 %v2884_v63, %v1372_v6  ;;  %vm1394_vm4 = vweird.f32 %v2884_v63 }
 0x1fb   : > { %2887 = vrcp.f32 %v1373_v11  ;;  %vm1395_vm6 = vmor %vm1393_vm5, %vm1394_vm4  ;;  %v1414_v54 = vand.u32 2147483648, %v1373_v11  ;;  %v1412_v6 = vand.u32 2147483647, %v1373_v11  ;;  %vm1408_vm9 = vweird.f32 %v1373_v11 }
 0x1fc   : > { %v1390_v17 = vsub.f32 1.0, %v1389_v51 }
 0x1fd   : > { %v1285_v43 = vpop.f32.mrf.mxu0  ;;  %vm1413_vm11 = vcmp.eq.f32.partialorder %v1412_v6, 8.507059e+37 }
 0x1fe   : > { %v1286_v10 = vadd.f32 %v1285_v43, %v1220_v12  ;;  %v1391_v62 = vmul.f32 %v2884_v63, %v1390_v17 }
 0x200   : > { %v2886_v45 = vpop.eup %2885  ;;  %v2774_v48 = vmul.f32 -1.442695, %v1286_v10  ;;  %v1392_v27 = vadd.f32 %v2884_v63, %v1391_v62 }
 0x201   : > { %v2888_v60 = vpop.eup %2887  ;;  %v1374_v44 = vadd.f32 1.0, %v2886_v45 }
 0x202   : > { %2889 = vpow2.f32 %v2774_v48  ;;  %v1396_v47 = vsel %vm1395_vm6, %v2884_v63, %v1392_v27  ;;  %v1404_v55 = vmul.f32 %v2888_v60, %v1373_v11  ;;  %vm1409_vm8 = vweird.f32 %v2888_v60  ;;  %v1232_v27 = vpop.f32.mrf.mxu3 }
 0x203   : > { %2891 = vrcp.f32 %v1374_v44  ;;  %v1401_v22 = vsel %vm1398_vm7, %v1400_v38, %v1396_v47  ;;  %vm1410_vm10 = vmor %vm1408_vm9, %vm1409_vm8  ;;  %v1415_v63 = vor.u32 1.1754944e-38, %v1414_v54  ;;  %v1429_v38 = vand.u32 2147483648, %v1374_v44 }
 0x204   : > { %1630 = vperm.xlu2 %2854, %v1401_v22   ;;  %1725 = vperm.xlu0 %2853, %v1401_v22   ;;  %v1405_v31 = vsub.f32 1.0, %v1404_v55  ;;  %v1427_v11 = vand.u32 2147483647, %v1374_v44  ;;  %vm1423_vm13 = vweird.f32 %v1374_v44 }
 0x205   : > { %v1288_v40 = vpop.f32.mrf.mxu0 }
 0x206   : > { %v1289_v12 = vadd.f32 %v1288_v40, %v1223_v16  ;;  %v1406_v0 = vmul.f32 %v2888_v60, %v1405_v31  ;;  %vm1428_vm15 = vcmp.eq.f32.partialorder %v1427_v11, 8.507059e+37 }
 0x208   : > { %v2890_v49 = vpop.eup %2889  ;;  %v2775_v51 = vmul.f32 -1.442695, %v1289_v12  ;;  %v1407_v17 = vadd.f32 %v2888_v60, %v1406_v0  ;;  %v1430_v12 = vor.u32 1.1754944e-38, %v1429_v38 }
 0x209   : > { %v2892_v43 = vpop.eup %2891  ;;  %v1375_v52 = vadd.f32 1.0, %v2890_v49 }
 0x20a   : > { %2893 = vpow2.f32 %v2775_v51  ;;  %v1411_v10 = vsel %vm1410_vm10, %v2888_v60, %v1407_v17  ;;  %v1419_v62 = vmul.f32 %v2892_v43, %v1374_v44  ;;  %vm1424_vm12 = vweird.f32 %v2892_v43  ;;  %v1229_v17 = vpop.f32.mrf.mxu2 }
 0x20b   : > { %2895 = vrcp.f32 %v1375_v52  ;;  %v1416_v45 = vsel %vm1413_vm11, %v1415_v63, %v1411_v10  ;;  %vm1425_vm14 = vmor %vm1423_vm13, %vm1424_vm12  ;;  %v1444_v10 = vand.u32 2147483648, %v1375_v52  ;;  %v1442_v44 = vand.u32 2147483647, %v1375_v52 }
 0x20c   : > { %1635 = vperm.xlu2 %2854, %v1416_v45   ;;  %1729 = vperm.xlu0 %2853, %v1416_v45   ;;  %v1420_v48 = vsub.f32 1.0, %v1419_v62  ;;  %v1235_v45 = vpop.f32.mrf.mxu3  ;;  %vm1438_vm5 = vweird.f32 %v1375_v52 }
 0x20d   : > { %v1291_v16 = vpop.f32.mrf.mxu0  ;;  %vm1443_vm7 = vcmp.eq.f32.partialorder %v1442_v44, 8.507059e+37 }
 0x20e   : > { %v1292_v47 = vadd.f32 %v1291_v16, %v1226_v3  ;;  %v1421_v55 = vmul.f32 %v2892_v43, %v1420_v48 }
 0x210   : > { %v2894_v22 = vpop.eup %2893  ;;  %v2776_v31 = vmul.f32 -1.442695, %v1292_v47  ;;  %v1422_v40 = vadd.f32 %v2892_v43, %v1421_v55  ;;  %v1445_v55 = vor.u32 1.1754944e-38, %v1444_v10 }
 0x211   : > { %v2896_v60 = vpop.eup %2895  ;;  %v1376_v54 = vadd.f32 1.0, %v2894_v22 }
 0x212   : > { %2897 = vpow2.f32 %v2776_v31  ;;  %v1426_v0 = vsel %vm1425_vm14, %v2892_v43, %v1422_v40  ;;  %v1434_v6 = vmul.f32 %v2896_v60, %v1375_v52  ;;  %vm1439_vm4 = vweird.f32 %v2896_v60 }
 0x213   : > { %2899 = vrcp.f32 %v1376_v54  ;;  %v1431_v49 = vsel %vm1428_vm15, %v1430_v12, %v1426_v0  ;;  %vm1440_vm6 = vmor %vm1438_vm5, %vm1439_vm4  ;;  %v1459_v0 = vand.u32 2147483648, %v1376_v54  ;;  %v1457_v52 = vand.u32 2147483647, %v1376_v54 }
 0x214   : > { %1733 = vperm.xlu1 %2855, %v1431_v49   ;;  %2858 = vset.pattern.permute.xlu0 %v2978_v53  ;;  %v1435_v51 = vsub.f32 1.0, %v1434_v6  ;;  %vm1453_vm9 = vweird.f32 %v1376_v54 }
 0x215   : > { %v1294_v63 = vpop.f32.mrf.mxu0  ;;  %v1460_v44 = vor.u32 1.1754944e-38, %v1459_v0  ;;  %vm1458_vm11 = vcmp.eq.f32.partialorder %v1457_v52, 8.507059e+37 }
 0x216   : > { %v1295_v62 = vadd.f32 %v1294_v63, %v1229_v17  ;;  %v1436_v3 = vmul.f32 %v2896_v60, %v1435_v51 }
 0x218   : > { %v2898_v48 = vpop.eup %2897  ;;  %v2777_v16 = vmul.f32 -1.442695, %v1295_v62  ;;  %v1437_v38 = vadd.f32 %v2896_v60, %v1436_v3  ;;  %v1238_v62 = vpop.f32.mrf.mxu3 }
 0x219   : > { %v2900_v43 = vpop.eup %2899  ;;  %v1377_v47 = vadd.f32 1.0, %v2898_v48 }
 0x21a   : > { %2901 = vpow2.f32 %v2777_v16  ;;  %v1441_v11 = vsel %vm1440_vm6, %v2896_v60, %v1437_v38  ;;  %v1449_v22 = vmul.f32 %v2900_v43, %v1376_v54  ;;  %vm1454_vm8 = vweird.f32 %v2900_v43 }
 0x21b   : > { %2903 = vrcp.f32 %v1377_v47  ;;  %v1446_v31 = vsel %vm1443_vm7, %v1445_v55, %v1441_v11  ;;  %vm1455_vm10 = vmor %vm1453_vm9, %vm1454_vm8  ;;  %v1474_v54 = vand.u32 2147483648, %v1377_v47  ;;  %vm1468_vm13 = vweird.f32 %v1377_v47 }
 0x21c   : > { %2856 = vset.pattern.permute.xlu1 %v2978_v53  ;;  %1645 = vperm.xlu0 %2858, %v1446_v31   ;;  %v1450_v40 = vsub.f32 1.0, %v1449_v22  ;;  %v1472_v22 = vand.u32 2147483647, %v1377_v47 }
 0x21d   : > { %v1297_v12 = vpop.f32.mrf.mxu0  ;;  %1640 = vperm.xlu1 %2856, %v1431_v49  }
 0x21e   : > { %v1298_v6 = vadd.f32 %v1297_v12, %v1232_v27  ;;  %v1451_v51 = vmul.f32 %v2900_v43, %v1450_v40  ;;  %vm1473_vm15 = vcmp.eq.f32.partialorder %v1472_v22, 8.507059e+37 }
 0x220   : > { %v2902_v17 = vpop.eup %2901  ;;  %v2778_v63 = vmul.f32 -1.442695, %v1298_v6  ;;  %v1452_v10 = vadd.f32 %v2900_v43, %v1451_v51  ;;  %v1475_v51 = vor.u32 1.1754944e-38, %v1474_v54 }
 0x221   : > { %v2904_v60 = vpop.eup %2903  ;;  %v1378_v3 = vadd.f32 1.0, %v2902_v17 }
 0x222   : > { %2905 = vpow2.f32 %v2778_v63  ;;  %v1456_v48 = vsel %vm1455_vm10, %v2900_v43, %v1452_v10  ;;  %v1464_v16 = vmul.f32 %v2904_v60, %v1377_v47  ;;  %vm1469_vm12 = vweird.f32 %v2904_v60  ;;  %v1241_v63 = vpop.f32.mrf.mxu3 }
 0x223   : > { %2907 = vrcp.f32 %v1378_v3  ;;  %v1461_v49 = vsel %vm1458_vm11, %v1460_v44, %v1456_v48  ;;  %vm1470_vm14 = vmor %vm1468_vm13, %vm1469_vm12  ;;  %v1489_v44 = vand.u32 2147483648, %v1378_v3  ;;  %vm1483_vm5 = vweird.f32 %v1378_v3 }
 0x224   : > { %1650 = vperm.xlu2 %2854, %v1461_v49   ;;  %2859 = vset.pattern.permute.xlu0 %v2977_v39  ;;  %v1465_v27 = vsub.f32 1.0, %v1464_v16  ;;  %v1487_v16 = vand.u32 2147483647, %v1378_v3 }
 0x225   : > { %v1300_v38 = vpop.f32.mrf.mxu0  ;;  %2857 = vset.pattern.permute.xlu1 %v2977_v39  ;;  %1741 = vperm.xlu0 %2859, %v1461_v49  }
 0x226   : > { %v1301_v55 = vadd.f32 %v1300_v38, %v1235_v45  ;;  %1737 = vperm.xlu1 %2857, %v1446_v31   ;;  %v1466_v11 = vmul.f32 %v2904_v60, %v1465_v27  ;;  %vm1488_vm7 = vcmp.eq.f32.partialorder %v1487_v16, 8.507059e+37 }
 0x228   : > { %v2906_v40 = vpop.eup %2905  ;;  %v2779_v43 = vmul.f32 -1.442695, %v1301_v55  ;;  %v1467_v12 = vadd.f32 %v2904_v60, %v1466_v11  ;;  %v1490_v55 = vor.u32 1.1754944e-38, %v1489_v44 }
 0x229   : > { %v2908_v0 = vpop.eup %2907  ;;  %v3888_v6 = vadd.f32 1.0, %v2906_v40 }
 0x22a   : > { %2909 = vpow2.f32 %v2779_v43  ;;  %v1471_v52 = vsel %vm1470_vm14, %v2904_v60, %v1467_v12  ;;  %v1479_v17 = vmul.f32 %v2908_v0, %v1378_v3  ;;  %vm1484_vm4 = vweird.f32 %v2908_v0  ;;  %v1244_v40 = vpop.f32.mrf.mxu3 }
 0x22b   : > { %2911 = vrcp.f32 %v3888_v6  ;;  %v1476_v45 = vsel %vm1473_vm15, %v1475_v51, %v1471_v52  ;;  %vm1485_vm6 = vmor %vm1483_vm5, %vm1484_vm4  ;;  %vm1498_vm10 = vweird.f32 %v3888_v6 }
 0x22c   : > { %2860 = vset.pattern.permute.xlu2 %v2977_v39  ;;  %v1480_v31 = vsub.f32 1.0, %v1479_v17 }
 0x22d   : > { %v1303_v10 = vpop.f32.mrf.mxu0  ;;  %1745 = vperm.xlu2 %2860, %v1476_v45  }
 0x22e   : > { %v1304_v47 = vadd.f32 %v1303_v10, %v1238_v62  ;;  %v1481_v48 = vmul.f32 %v2908_v0, %v1480_v31 }
 0x230   : > { %v2910_v49 = vpop.eup %2909  ;;  %v2780_v27 = vmul.f32 -1.442695, %v1304_v47  ;;  %v1482_v38 = vadd.f32 %v2908_v0, %v1481_v48 }
 0x231   : > { %v3892_v60 = vpop.eup %2911  ;;  %v1380_v54 = vadd.f32 1.0, %v2910_v49 }
 0x232   : > { %2913 = vpow2.f32 %v2780_v27  ;;  %v1486_v11 = vsel %vm1485_vm6, %v2908_v0, %v1482_v38  ;;  %v1494_v22 = vmul.f32 %v3892_v60, %v3888_v6  ;;  %vm1499_vm8 = vweird.f32 %v3892_v60  ;;  %v1247_v27 = vpop.f32.mrf.mxu3 }
 0x233   : > { %2915 = vrcp.f32 %v1380_v54  ;;  %v1491_v62 = vsel %vm1488_vm7, %v1490_v55, %v1486_v11  ;;  %v1517_v48 = vand.u32 2147483647, %v1380_v54  ;;  %v1519_v16 = vand.u32 2147483648, %v1380_v54  ;;  %vm3904_vm12 = vmor %vm1498_vm10, %vm1499_vm8 }
 0x234   : > { %1749 = vperm.xlu1 %2857, %v1491_v62   ;;  %v1495_v3 = vsub.f32 1.0, %v1494_v22  ;;  %v1504_v38 = vand.u32 2147483648, %v3888_v6  ;;  %vm1513_vm11 = vweird.f32 %v1380_v54 }
 0x235   : > { %v1306_v43 = vpop.f32.mrf.mxu0  ;;  %2861 = vset.pattern.permute.xlu2 %v2978_v53  ;;  %vm1518_vm14 = vcmp.eq.f32.partialorder %v1517_v48, 8.507059e+37 }
 0x236   : > { %v1307_v12 = vadd.f32 %v1306_v43, %v1241_v63  ;;  %1655 = vperm.xlu2 %2861, %v1476_v45   ;;  %v1496_v10 = vmul.f32 %v3892_v60, %v1495_v3  ;;  %v1520_v3 = vor.u32 1.1754944e-38, %v1519_v16 }
 0x238   : > { %v2914_v51 = vpop.eup %2913  ;;  %v2781_v52 = vmul.f32 -1.442695, %v1307_v12  ;;  %v1497_v49 = vadd.f32 %v3892_v60, %v1496_v10  ;;  %v1505_v10 = vor.u32 1.1754944e-38, %v1504_v38 }
 0x239   : > { %v2916_v17 = vpop.eup %2915  ;;  %v1381_v31 = vadd.f32 1.0, %v2914_v51 }
 0x23a   : > { %2917 = vpow2.f32 %v2781_v52  ;;  %v1509_v0 = vmul.f32 %v2916_v17, %v1380_v54  ;;  %vm1514_vm9 = vweird.f32 %v2916_v17  ;;  %v1501_v52 = vsel %vm3904_vm12, %v3892_v60, %v1497_v49  ;;  %v1250_v38 = vpop.f32.mrf.mxu3 }
 0x23b   : > { %2919 = vrcp.f32 %v1381_v31  ;;  %vm1515_vm13 = vmor %vm1513_vm11, %vm1514_vm9  ;;  %v1534_v48 = vand.u32 2147483648, %v1381_v31  ;;  %vm1528_vm5 = vweird.f32 %v1381_v31 }
 0x23c   : > { %2862 = vset.pattern.permute.xlu1 %v2978_v53  ;;  %v1510_v44 = vsub.f32 1.0, %v1509_v0 }
 0x23d   : > { %v1309_v47 = vpop.f32.mrf.mxu0  ;;  %1660 = vperm.xlu1 %2862, %v1491_v62  }
 0x23e   : > { %v1310_v63 = vadd.f32 %v1309_v47, %v1244_v40  ;;  %v1511_v45 = vmul.f32 %v2916_v17, %v1510_v44  ;;  %2866 = vset.pattern.permute.xlu2 %v2977_v39  ;;  %v1502_v40 = vand.u32 2147483647, %v3888_v6 }
 0x240   : > { %v2918_v55 = vpop.eup %2917  ;;  %v2782_v11 = vmul.f32 -1.442695, %v1310_v63  ;;  %v1512_v22 = vadd.f32 %v2916_v17, %v1511_v45  ;;  %vm1503_vm15 = vcmp.eq.f32.partialorder %v1502_v40, 8.507059e+37  ;;  %v1532_v63 = vand.u32 2147483647, %v1381_v31 }
 0x241   : > { %v2920_v43 = vpop.eup %2919  ;;  %v3909_v12 = vadd.f32 1.0, %v2918_v55  ;;  %v1506_v47 = vsel %vm1503_vm15, %v1505_v10, %v1501_v52 }
 0x242   : > { %2921 = vpow2.f32 %v2782_v11  ;;  %v1516_v51 = vsel %vm1515_vm13, %v2916_v17, %v1512_v22  ;;  %v1524_v0 = vmul.f32 %v2920_v43, %v1381_v31  ;;  %vm1529_vm4 = vweird.f32 %v2920_v43 }
 0x243   : > { %2923 = vrcp.f32 %v3909_v12  ;;  %v1521_v54 = vsel %vm1518_vm14, %v1520_v3, %v1516_v51  ;;  %vm1530_vm6 = vmor %vm1528_vm5, %vm1529_vm4  ;;  %v1535_v22 = vor.u32 1.1754944e-38, %v1534_v48  ;;  %vm1533_vm7 = vcmp.eq.f32.partialorder %v1532_v63, 8.507059e+37  ;;  %v1253_v48 = vpop.f32.mrf.mxu3 }
 0x244   : > { %1757 = vperm.xlu0 %2859, %v1521_v54   ;;  %v1525_v6 = vsub.f32 1.0, %v1524_v0  ;;  %vm1543_vm10 = vweird.f32 %v3909_v12 }
 0x245   : > { %v1312_v44 = vpop.f32.mrf.mxu0  ;;  %2863 = vset.pattern.permute.xlu1 %v2977_v39 }
 0x246   : > { %v1313_v16 = vadd.f32 %v1312_v44, %v1247_v27  ;;  %1753 = vperm.xlu1 %2863, %v1506_v47   ;;  %v1526_v17 = vmul.f32 %v2920_v43, %v1525_v6 }
 0x248   : > { %v2922_v45 = vpop.eup %2921  ;;  %v2783_v60 = vmul.f32 -1.442695, %v1313_v16  ;;  %v1527_v49 = vadd.f32 %v2920_v43, %v1526_v17 }
 0x249   : > { %v3916_v55 = vpop.eup %2923  ;;  %v1383_v11 = vadd.f32 1.0, %v2922_v45 }
 0x24a   : > { %2925 = vpow2.f32 %v2783_v60  ;;  %v1531_v62 = vsel %vm1530_vm6, %v2920_v43, %v1527_v49  ;;  %v1539_v27 = vmul.f32 %v3916_v55, %v3909_v12  ;;  %vm1544_vm8 = vweird.f32 %v3916_v55 }
 0x24b   : > { %2927 = vrcp.f32 %v1383_v11  ;;  %v1536_v40 = vsel %vm1533_vm7, %v1535_v22, %v1531_v62  ;;  %v1562_v17 = vand.u32 2147483647, %v1383_v11  ;;  %v1564_v63 = vand.u32 2147483648, %v1383_v11  ;;  %vm3933_vm12 = vmor %vm1543_vm10, %vm1544_vm8 }
 0x24c   : > { %2865 = vset.pattern.permute.xlu0 %v2978_v53  ;;  %1761 = vperm.xlu2 %2866, %v1536_v40   ;;  %v1540_v51 = vsub.f32 1.0, %v1539_v27  ;;  %v1549_v49 = vand.u32 2147483648, %v3909_v12  ;;  %vm1558_vm11 = vweird.f32 %v1383_v11 }
 0x24d   : > { %v1315_v3 = vpop.f32.mrf.mxu0  ;;  %1670 = vperm.xlu0 %2865, %v1521_v54   ;;  %vm1563_vm14 = vcmp.eq.f32.partialorder %v1562_v17, 8.507059e+37 }
 0x24e   : > { %v1316_v31 = vadd.f32 %v1315_v3, %v1250_v38  ;;  %2864 = vset.pattern.permute.xlu1 %v2978_v53  ;;  %v1541_v44 = vmul.f32 %v3916_v55, %v1540_v51  ;;  %v1565_v51 = vor.u32 1.1754944e-38, %v1564_v63 }
 0x24f   : > { %1665 = vperm.xlu1 %2864, %v1506_v47  }
 0x250   : > { %v2926_v52 = vpop.eup %2925  ;;  %v2784_v0 = vmul.f32 -1.442695, %v1316_v31  ;;  %v1542_v60 = vadd.f32 %v3916_v55, %v1541_v44  ;;  %v1550_v44 = vor.u32 1.1754944e-38, %v1549_v49 }
 0x251   : > { %v2928_v10 = vpop.eup %2927  ;;  %v3922_v43 = vadd.f32 1.0, %v2926_v52 }
 0x252   : > { %2929 = vpow2.f32 %v2784_v0  ;;  %v1554_v6 = vmul.f32 %v2928_v10, %v1383_v11  ;;  %vm1559_vm9 = vweird.f32 %v2928_v10  ;;  %v1546_v0 = vsel %vm3933_vm12, %v3916_v55, %v1542_v60 }
 0x253   : > { %2931 = vrcp.f32 %v3922_v43  ;;  %vm1560_vm13 = vmor %vm1558_vm11, %vm1559_vm9  ;;  %vm1573_vm6 = vweird.f32 %v3922_v43 }
 0x254   : > { %2867 = vset.pattern.permute.xlu2 %v2978_v53  ;;  %v1555_v54 = vsub.f32 1.0, %v1554_v6 }
 0x255   : > { %v1318_v16 = vpop.f32.mrf.mxu0  ;;  %1675 = vperm.xlu2 %2867, %v1536_v40   ;;  %2874 = vset.pattern.permute.xlu0 %v2977_v39  ;;  %v1547_v40 = vand.u32 2147483647, %v3909_v12  ;;  %v1256_v12 = vpop.f32.mrf.mxu3 }
 0x256   : > { %v1319_v47 = vadd.f32 %v1318_v16, %v1253_v48  ;;  %v1556_v45 = vmul.f32 %v2928_v10, %v1555_v54 }
 0x257   : > { %2870 = vset.pattern.permute.xlu1 %v2977_v39  ;;  %vm1548_vm15 = vcmp.eq.f32.partialorder %v1547_v40, 8.507059e+37  ;;  %v1579_v40 = vand.u32 2147483648, %v3922_v43 }
 0x258   : > { %v2930_v38 = vpop.eup %2929  ;;  %v2785_v22 = vmul.f32 -1.442695, %v1319_v47  ;;  %v1557_v62 = vadd.f32 %v2928_v10, %v1556_v45  ;;  %v1551_v54 = vsel %vm1548_vm15, %v1550_v44, %v1546_v0 }
 0x259   : > { %v3938_v3 = vpop.eup %2931  ;;  %v1385_v31 = vadd.f32 1.0, %v2930_v38 }
 0x25a   : > { %2933 = vpow2.f32 %v2785_v22  ;;  %v1561_v52 = vsel %vm1560_vm13, %v2928_v10, %v1557_v62  ;;  %v1569_v11 = vmul.f32 %v3938_v3, %v3922_v43  ;;  %vm1574_vm4 = vweird.f32 %v3938_v3 }
 0x25b   : > { %2935 = vrcp.f32 %v1385_v31  ;;  %v1566_v6 = vsel %vm1563_vm14, %v1565_v51, %v1561_v52  ;;  %v1594_v38 = vand.u32 2147483648, %v1385_v31  ;;  %v1592_v62 = vand.u32 2147483647, %v1385_v31  ;;  %vm3953_vm8 = vmor %vm1573_vm6, %vm1574_vm4 }
 0x25c   : > { %1769 = vperm.xlu1 %2870, %v1566_v6   ;;  %v1570_v10 = vsub.f32 1.0, %v1569_v11  ;;  %vm1588_vm7 = vweird.f32 %v1385_v31  ;;  %v1577_v11 = vand.u32 2147483647, %v3922_v43 }
 0x25d   : > { %v1321_v48 = vpop.f32.mrf.mxu0  ;;  %2868 = vset.pattern.permute.xlu2 %v2977_v39  ;;  %vm1593_vm10 = vcmp.eq.f32.partialorder %v1592_v62, 8.507059e+37 }
 0x25e   : > { %v1322_v16 = vadd.f32 %v1321_v48, %v1256_v12  ;;  %1765 = vperm.xlu2 %2868, %v1551_v54   ;;  %v1571_v60 = vmul.f32 %v3938_v3, %v1570_v10  ;;  %v1595_v12 = vor.u32 1.1754944e-38, %v1594_v38  ;;  %vm1578_vm11 = vcmp.eq.f32.partialorder %v1577_v11, 8.507059e+37 }
 0x260   : > { %v2934_v17 = vpop.eup %2933  ;;  %v2786_v63 = vmul.f32 -1.442695, %v1322_v16  ;;  %v1572_v27 = vadd.f32 %v3938_v3, %v1571_v60 }
 0x261   : > { %v2936_v47 = vpop.eup %2935  ;;  %v1386_v55 = vadd.f32 1.0, %v2934_v17 }
 0x262   : > { %2937 = vpow2.f32 %v2786_v63  ;;  %v1584_v45 = vmul.f32 %v2936_v47, %v1385_v31  ;;  %vm1589_vm5 = vweird.f32 %v2936_v47  ;;  %v1580_v31 = vor.u32 1.1754944e-38, %v1579_v40 }
 0x263   : > { %2939 = vrcp.f32 %v1386_v55  ;;  %vm1590_vm9 = vmor %vm1588_vm7, %vm1589_vm5  ;;  %v1609_v63 = vand.u32 2147483648, %v1386_v55  ;;  %vm1603_vm13 = vweird.f32 %v1386_v55 }
 0x264   : > { %2871 = vset.pattern.permute.xlu1 %v2978_v53  ;;  %v1585_v49 = vsub.f32 1.0, %v1584_v45 }
 0x265   : > { %1685 = vperm.xlu1 %2871, %v1566_v6  }
 0x266   : > { %2869 = vset.pattern.permute.xlu2 %v2978_v53  ;;  %v1586_v22 = vmul.f32 %v2936_v47, %v1585_v49  ;;  %v1610_v49 = vor.u32 1.1754944e-38, %v1609_v63  ;;  %v1863_v63 = vld [vmem:[%s4249_s4 + $0x78] sm:$0xff] }
 0x267   : > { %1680 = vperm.xlu2 %2869, %v1551_v54   ;;  %v1576_v54 = vsel %vm3953_vm8, %v3938_v3, %v1572_v27  ;;  %1864 = vmatpush.msra.mxu1 %v1863_v63  ;;  %v1914_v63 = vld [vmem:[%s4250_s5 + $0x58] sm:$0xff] }
 0x268   : > { %v2938_v51 = vpop.eup %2937  ;;  %v1587_v52 = vadd.f32 %v2936_v47, %v1586_v22  ;;  %v1581_v43 = vsel %vm1578_vm11, %v1580_v31, %v1576_v54 }
 0x269   : > { %v2940_v6 = vpop.eup %2939  ;;  %v1387_v44 = vadd.f32 1.0, %v2938_v51 }
 0x26a   : > { %v1591_v48 = vsel %vm1590_vm9, %v2936_v47, %v1587_v52  ;;  %v1599_v16 = vmul.f32 %v2940_v6, %v1386_v55  ;;  %vm1604_vm12 = vweird.f32 %v2940_v6  ;;  %v1607_v47 = vand.u32 2147483647, %v1386_v55 }
 0x26b   : > { %2941 = vrcp.f32 %v1387_v44  ;;  %v1596_v10 = vsel %vm1593_vm10, %v1595_v12, %v1591_v48  ;;  %vm1605_vm14 = vmor %vm1603_vm13, %vm1604_vm12  ;;  %v1624_v40 = vand.u32 2147483648, %v1387_v44  ;;  %v1622_v52 = vand.u32 2147483647, %v1387_v44  ;;  %v1631_v12 = vpop.permute.xlu2 %1630 }
 0x26c   : > { %1777 = vperm.xlu0 %2874, %v1596_v10   ;;  %v1600_v17 = vsub.f32 1.0, %v1599_v16  ;;  %vm1608_vm15 = vcmp.eq.f32.partialorder %v1607_v47, 8.507059e+37  ;;  %vm1618_vm5 = vweird.f32 %v1387_v44 }
 0x26d   : > { %2872 = vset.pattern.permute.xlu1 %v2977_v39  ;;  %v1625_v0 = vor.u32 1.1754944e-38, %v1624_v40  ;;  %vm1623_vm7 = vcmp.eq.f32.partialorder %v1622_v52, 8.507059e+37  ;;  %v1860_v52 = vld [vmem:[%s4249_s4 + $0x60] sm:$0xff] }
 0x26e   : > { %1773 = vperm.xlu1 %2872, %v1581_v43   ;;  %v1601_v45 = vmul.f32 %v2940_v6, %v1600_v17 }
 0x26f   : > { %2875 = vset.pattern.permute.xlu2 %v2977_v39 }
 0x270   : > { %v1602_v60 = vadd.f32 %v2940_v6, %v1601_v45 }
 0x271   : > { %v2942_v3 = vpop.eup %2941 }
 0x272   : > { %v1606_v38 = vsel %vm1605_vm14, %v2940_v6, %v1602_v60  ;;  %v1614_v22 = vmul.f32 %v2942_v3, %v1387_v44  ;;  %vm1619_vm4 = vweird.f32 %v2942_v3 }
 0x273   : > { %v1611_v62 = vsel %vm1608_vm15, %v1610_v49, %v1606_v38  ;;  %vm1620_vm6 = vmor %vm1618_vm5, %vm1619_vm4  ;;  %v1636_v54 = vpop.permute.xlu2 %1635  ;;  %v1918_v49 = vld [vmem:[%s4250_s5 + $0x78] sm:$0xff]  ;;  %v1917_v38 = vld [vmem:[%s4250_s5 + $0x70] sm:$0xff] }
 0x274   : > { %2876 = vset.pattern.permute.xlu0 %v2978_v53  ;;  %1781 = vperm.xlu2 %2875, %v1611_v62   ;;  %v1615_v27 = vsub.f32 1.0, %v1614_v22 }
 0x275   : > { %1695 = vperm.xlu0 %2876, %v1596_v10   ;;  %1919 = vmatpush.msra.mxu2 %v1918_v49  ;;  %v4033_v49 = vmul.f32 %v1631_v12, %v3270_v1  ;;  %v1909_v12 = vld [vmem:[%s4250_s5 + $0x30] sm:$0xff] }
 0x276   : > { %2873 = vset.pattern.permute.xlu1 %v2978_v53  ;;  %v1616_v51 = vmul.f32 %v2942_v3, %v1615_v27  ;;  %v1916_v27 = vld [vmem:[%s4250_s5 + $0x68] sm:$0xff] }
 0x277   : > { %1690 = vperm.xlu1 %2873, %v1581_v43   ;;  %v1726_v43 = vpop.permute.xlu0 %1725  ;;  %1920 = vmatpush.msra.mxu2 %v1917_v38 }
 0x278   : > { %v1617_v55 = vadd.f32 %v2942_v3, %v1616_v51 }
 0x279   : > { %1921 = vmatpush.msra.mxu2 %v1916_v27 }
 0x27a   : > { %v1621_v11 = vsel %vm1620_vm6, %v2942_v3, %v1617_v55  ;;  %v1861_v3 = vld [vmem:[%s4249_s4 + $0x68] sm:$0xff]  ;;  %v1915_v55 = vld [vmem:[%s4250_s5 + $0x60] sm:$0xff] }
 0x27b   : > { %v1626_v6 = vsel %vm1623_vm7, %v1625_v0, %v1621_v11  ;;  %v4005_v0 = vmul.f32 %v1726_v43, %v3423_v5  ;;  %1922 = vmatpush.msra.mxu2 %v1915_v55  ;;  %v4024_v43 = vmul.f32 %v1636_v54, %v3287_v7  ;;  %v1911_v7 = vld [vmem:[%s4250_s5 + $0x40] sm:$0xff] }
 0x27c   : > { %1785 = vperm.xlu2 %2875, %v1626_v6  }
 0x27d   : > { %2878 = vset.pattern.permute.xlu0 %v2977_v39  ;;  %1923 = vmatpush.msra.mxu2 %v1914_v63  ;;  %v1804_v27 = vadd.f32 %v4024_v43, %v4033_v49 }
 0x27e   : > { %v3967_v10 = vpop.permute.xlu2 %1650 }
 0x27f   : > { %1700 = vperm.xlu1 %2873, %v1611_v62   ;;  %v1730_v47 = vpop.permute.xlu0 %1729 }
 0x280   : > { %v3996_v51 = vmul.f32 %v1730_v47, %v3441_v24 }
 0x282   : > { %v1826_v24 = vadd.f32 %v3996_v51, %v4005_v0 }
 0x284   : > { %2877 = vset.pattern.permute.xlu2 %v2978_v53  ;;  %v1862_v53 = vld [vmem:[%s4249_s4 + $0x70] sm:$0xff] }
 0x285   : > { %1705 = vperm.xlu2 %2877, %v1626_v6   ;;  %1865 = vmatpush.msra.mxu1 %v1862_v53 }
 0x286   : > { %v1734_v48 = vpop.permute.xlu1 %1733 }
 0x287   : > { %v1746_v44 = vpop.permute.xlu2 %1745  ;;  %1866 = vmatpush.msra.mxu1 %v1861_v3  ;;  %v4008_v11 = vmul.f32 %v1734_v48, %v3461_v59  ;;  %v1913_v59 = vld [vmem:[%s4250_s5 + $0x50] sm:$0xff] }
 0x288   : > { %1924 = vmatpush.msra.mxu2 %v1913_v59 }
 0x289   : > { %1867 = vmatpush.msra.mxu1 %v1860_v52  ;;  %v1827_v53 = vadd.f32 %v1826_v24, %v4008_v11  ;;  %v1793_v52 = vmul.f32 %v1746_v44, %v3501_v18  ;;  %v1908_v18 = vld [vmem:[%s4250_s5 + $0x28] sm:$0xff] }
 0x28e   : > { %v1646_v22 = vpop.permute.xlu0 %1645 }
 0x28f   : > { %v1641_v16 = vpop.permute.xlu1 %1640  ;;  %v4063_v63 = vmul.f32 %v1646_v22, %v3323_v19  ;;  %v1906_v19 = vld [vmem:[%s4250_s5 + $0x18] sm:$0xff] }
 0x290   : > { %v3972_v39 = vpop.permute.xlu2 %1655  ;;  %v4036_v38 = vmul.f32 %v1641_v16, %v3305_v13  ;;  %v1859_v13 = vld [vmem:[%s4249_s4 + $0x58] sm:$0xff] }
 0x291   : > { %1868 = vmatpush.msra.mxu1 %v1859_v13  ;;  %v1855_v13 = vld [vmem:[%s4249_s4 + $0x38] sm:$0xff] }
 0x292   : > { %v1805_v16 = vadd.f32 %v1804_v27, %v4036_v38 }
 0x294   : > { %v1806_v59 = vadd.f32 %v1805_v16, %v4063_v63 }
 0x297   : > { %v1742_v47 = vpop.permute.xlu0 %1741 }
 0x298   : > { %v1738_v31 = vpop.permute.xlu1 %1737  ;;  %v1792_v3 = vmul.f32 %v1742_v47, %v3488_v57  ;;  %v1910_v57 = vld [vmem:[%s4250_s5 + $0x38] sm:$0xff] }
 0x299   : > { %v4013_v6 = vmul.f32 %v1738_v31, %v3474_v30  ;;  %v1912_v31 = vld [vmem:[%s4250_s5 + $0x48] sm:$0xff] }
 0x29a   : > { %1925 = vmatpush.msra.mxu2 %v1912_v31 }
 0x29b   : > { %v1828_v48 = vadd.f32 %v1827_v53, %v4013_v6  ;;  %v1907_v53 = vld [vmem:[%s4250_s5 + $0x20] sm:$0xff] }
 0x29c   : > { %1926 = vmatpush.msra.mxu2 %v1911_v7  ;;  %v1905_v7 = vld [vmem:[%s4250_s5 + $0x10] sm:$0xff] }
 0x29d   : > { %v1829_v54 = vadd.f32 %v1828_v48, %v1792_v3 }
 0x29e   : > { %1927 = vmatpush.msra.mxu2 %v1910_v57 }
 0x29f   : > { %v1830_v44 = vadd.f32 %v1829_v54, %v1793_v52  ;;  %v1904_v52 = vld [vmem:[%s4250_s5 + $0x8] sm:$0xff] }
 0x2a0   : > { %1928 = vmatpush.msra.mxu2 %v1909_v12 }
 0x2a2   : > { %1929 = vmatpush.msra.mxu2 %v1908_v18  ;;  %v1852_v18 = vld [vmem:[%s4249_s4 + $0x20] sm:$0xff] }
 0x2a4   : > { %1930 = vmatpush.msra.mxu2 %v1907_v53  ;;  %v1850_v53 = vld [vmem:[%s4249_s4 + $0x10] sm:$0xff] }
 0x2a6   : > { %v1750_v17 = vpop.permute.xlu1 %1749  ;;  %v3979_v60 = vpop.permute.xlu2 %1761  ;;  %1931 = vmatpush.msra.mxu2 %v1906_v19 }
 0x2a7   : > { %v1794_v1 = vmul.f32 %v1750_v17, %v3514_v58  ;;  %v1858_v58 = vld [vmem:[%s4249_s4 + $0x50] sm:$0xff] }
 0x2a8   : > { %1869 = vmatpush.msra.mxu1 %v1858_v58  ;;  %1932 = vmatpush.msra.mxu2 %v1905_v7 }
 0x2a9   : > { %v1831_v47 = vadd.f32 %v1830_v44, %v1794_v1  ;;  %v1797_v1 = vmul.f32 %v3979_v60, %v3543_v46  ;;  %v1854_v46 = vld [vmem:[%s4249_s4 + $0x30] sm:$0xff]  ;;  %v1851_v44 = vld [vmem:[%s4249_s4 + $0x18] sm:$0xff] }
 0x2aa   : > { %1933 = vmatpush.msra.mxu2 %v1904_v52 }
 0x2af   : > { %v3977_v45 = vpop.permute.xlu1 %1660  ;;  %v3993_v40 = vpop.permute.xlu2 %1675 }
 0x2b6   : > { %v1758_v55 = vpop.permute.xlu0 %1757 }
 0x2b7   : > { %v1796_v22 = vmul.f32 %v1758_v55, %v3540_v56  ;;  %v1713_v56 = vmul.f32 %v3972_v39, %v3348_v28 }
 0x2b8   : > { %v1754_v62 = vpop.permute.xlu1 %1753  ;;  %v4026_v30 = vpop.permute.xlu2 %1765 }
 0x2b9   : > { %v1795_v17 = vmul.f32 %v1754_v62, %v3525_v33  ;;  %v1712_v33 = vmul.f32 %v3967_v10, %v3341_v25  ;;  %v1857_v62 = vld [vmem:[%s4249_s4 + $0x48] sm:$0xff]  ;;  %v1856_v25 = vld [vmem:[%s4249_s4 + $0x40] sm:$0xff]  ;;  %v1714_v10 = vmul.f32 %v3977_v45, %v3372_v41  ;;  %v1798_v16 = vmul.f32 %v4026_v30, %v3560_v21 }
 0x2ba   : > { %1870 = vmatpush.msra.mxu1 %v1857_v62  ;;  %v1903_v41 = vld [vmem:[%s4250_s5] sm:$0xff] }
 0x2bb   : > { %v1832_v31 = vadd.f32 %v1831_v47, %v1795_v17  ;;  %v1807_v3 = vadd.f32 %v1806_v59, %v1712_v33  ;;  %1934 = vmatpush.msra.mxu2 %v1903_v41  ;;  %v1849_v33 = vld [vmem:[%s4249_s4 + $0x8] sm:$0xff]  ;;  %v1848_v62 = vld [vmem:[%s4249_s4] sm:$0xff] }
 0x2bc   : > { %1871 = vmatpush.msra.mxu1 %v1856_v25 }
 0x2bd   : > { %v1833_v54 = vadd.f32 %v1832_v31, %v1796_v22  ;;  %v1808_v12 = vadd.f32 %v1807_v3, %v1713_v56 }
 0x2be   : > { %1872 = vmatpush.msra.mxu1 %v1855_v13 }
 0x2bf   : > { %v1671_v57 = vpop.permute.xlu0 %1670  ;;  %v1834_v45 = vadd.f32 %v1833_v54, %v1797_v1  ;;  %v1809_v60 = vadd.f32 %v1808_v12, %v1714_v10 }
 0x2c0   : > { %1873 = vmatpush.msra.mxu1 %v1854_v46  ;;  %v1716_v17 = vmul.f32 %v1671_v57, %v3439_v23  ;;  %v1717_v23 = vmul.f32 %v3993_v40, %v3272_v2 }
 0x2c1   : > { %v1666_v5 = vpop.permute.xlu1 %1665  ;;  %v4069_v48 = vpop.permute.xlu2 %1680  ;;  %v1835_v58 = vadd.f32 %v1834_v45, %v1798_v16 }
 0x2c2   : > { %v1715_v28 = vmul.f32 %v1666_v5, %v3421_v4  ;;  %v1853_v4 = vld [vmem:[%s4249_s4 + $0x28] sm:$0xff]  ;;  %v1718_v2 = vmul.f32 %v4069_v48, %v3289_v8 }
 0x2c3   : > { %1874 = vmatpush.msra.mxu1 %v1853_v4 }
 0x2c4   : > { %v1810_v5 = vadd.f32 %v1809_v60, %v1715_v28 }
 0x2c5   : > { %1875 = vmatpush.msra.mxu1 %v1852_v18 }
 0x2c6   : > { %v1811_v47 = vadd.f32 %v1810_v5, %v1716_v17 }
 0x2c7   : > { %1876 = vmatpush.msra.mxu1 %v1851_v44 }
 0x2c8   : > { %v1812_v3 = vadd.f32 %v1811_v47, %v1717_v23 }
 0x2c9   : > { %1877 = vmatpush.msra.mxu1 %v1850_v53 }
 0x2ca   : > { %v1813_v25 = vadd.f32 %v1812_v3, %v1718_v2 }
 0x2cb   : > { %1878 = vmatpush.msra.mxu1 %v1849_v33 }
 0x2cd   : > { %1879 = vmatpush.msra.mxu1 %v1848_v62 }
 0x2ce   : > { %v1770_v24 = vpop.permute.xlu1 %1769  ;;  %v1782_v39 = vpop.permute.xlu2 %1781 }
 0x2cf   : > { %v1799_v55 = vmul.f32 %v1770_v24, %v3588_v37 }
 0x2d1   : > { %v1836_v37 = vadd.f32 %v1835_v58, %v1799_v55 }
 0x2d6   : > { %v1786_v19 = vpop.permute.xlu2 %1785 }
 0x2d7   : > { %v1686_v27 = vpop.permute.xlu1 %1685 }
 0x2d8   : > { %v1719_v40 = vmul.f32 %v1686_v27, %v3307_v14 }
 0x2da   : > { %v1814_v57 = vadd.f32 %v1813_v25, %v1719_v40 }
 0x2de   : > { %v1778_v21 = vpop.permute.xlu0 %1777 }
 0x2df   : > { %v1801_v59 = vmul.f32 %v1778_v21, %v3638_v35  ;;  %v4135_v35 = vmul.f32 %v1786_v19, %v3668_v9  ;;  %v1706_v28 = vpop.permute.xlu2 %1705 }
 0x2e0   : > { %v1774_v30 = vpop.permute.xlu1 %1773  ;;  %v4148_v41 = vmul.f32 %v1706_v28, %v3374_v42 }
 0x2e1   : > { %v1800_v24 = vmul.f32 %v1774_v30, %v3613_v50  ;;  %v4129_v50 = vmul.f32 %v1782_v39, %v3651_v61 }
 0x2e3   : > { %v1837_v31 = vadd.f32 %v1836_v37, %v1800_v24 }
 0x2e5   : > { %v1838_v22 = vadd.f32 %v1837_v31, %v1801_v59 }
 0x2e7   : > { %v1839_v7 = vadd.f32 %v1838_v22, %v4129_v50  ;;  %v1696_v1 = vpop.permute.xlu0 %1695 }
 0x2e8   : > { %v1721_v12 = vmul.f32 %v1696_v1, %v3343_v26 }
 0x2e9   : > { %v1840_v61 = vadd.f32 %v1839_v7, %v4135_v35  ;;  %v1691_v54 = vpop.permute.xlu1 %1690 }
 0x2ea   : > { %v1720_v56 = vmul.f32 %v1691_v54, %v3325_v20 }
 0x2eb   : > { %v1841_v10 = vrot.slane %v1840_v61, 4 }
 0x2ec   : > { %v1815_v9 = vadd.f32 %v1814_v57, %v1720_v56 }
 0x2ed   : > { %v1842_v52 = vadd.f32 %v1841_v10, %v1840_v61 }
 0x2ee   : > { %v1816_v48 = vadd.f32 %v1815_v9, %v1721_v12 }
 0x2ef   : > { %v1843_v13 = vrot.slane %v1842_v52, 2 }
 0x2f1   : > { %v1701_v39 = vpop.permute.xlu1 %1700  ;;  %v1844_v8 = vadd.f32 %v1843_v13, %v1842_v52  ;;  %v4155_v52 = vld [vmem:[%s4251_s6] sm:$0xff] }
 0x2f2   : > { %v4145_v14 = vmul.f32 %v1701_v39, %v3350_v29  ;;  %v2105_v12 = vperm.slane %v4155_v52, 0  ;;  %v2122_v28 = vperm.slane %v4155_v52, 1  ;;  %v2317_v36 = vperm.slane %v4155_v52, 4 }
 0x2f3   : > { %v1845_v27 = vrot.slane %v1844_v8, 1 }
 0x2f4   : > { %v1817_v20 = vadd.f32 %v1816_v48, %v4145_v14 }
 0x2f5   : > { %v1846_v45 = vadd.f32 %v1845_v27, %v1844_v8 }
 0x2f6   : > { %v1818_v46 = vadd.f32 %v1817_v20, %v4148_v41 }
 0x2f7   : > { %v1847_v60 = vmul.f32 0.0625, %v1846_v45 }
 0x2f8   : > { %v1819_v16 = vrot.slane %v1818_v46, 4 }
 0x2f9   : > { %1935 = vmatmul.f32.vlgmr.msra.gmra.mxu2 %v1847_v60 }
 0x2fa   : > { %v1820_v26 = vadd.f32 %v1819_v16, %v1818_v46 }
 0x2fc   : > { %v1821_v55 = vrot.slane %v1820_v26, 2 }
 0x2fe   : > { %v1822_v4 = vadd.f32 %v1821_v55, %v1820_v26 }
 0x300   : > { %v1823_v5 = vrot.slane %v1822_v4, 1 }
 0x302   : > { %v1824_v18 = vadd.f32 %v1823_v5, %v1822_v4 }
 0x304   : > { %v1825_v58 = vmul.f32 0.0625, %v1824_v18 }
 0x306   : > { %1880 = vmatmul.f32.vlgmr.msra.gmra.mxu1 %v1825_v58 }
 0x37c   : > { %v1936_v29 = vpop.f32.mrf.mxu2 }
 0x37d   : > { %v2788_v44 = vmul.f32 -1.442695, %v1936_v29 }
 0x37f   : > { %2943 = vpow2.f32 %v2788_v44 }
 0x383   : > { %v1881_v42 = vpop.f32.mrf.mxu1 }
 0x384   : > { %v2787_v17 = vmul.f32 -1.442695, %v1881_v42 }
 0x385   : > { %v2944_v21 = vpop.eup %2943 }
 0x386   : > { %v1942_v30 = vadd.f32 1.0, %v2944_v21  ;;  %2945 = vpow2.f32 %v2787_v17 }
 0x388   : > { %2947 = vrcp.f32 %v1942_v30  ;;  %v1954_v33 = vand.u32 2147483648, %v1942_v30  ;;  %vm1948_vm9 = vweird.f32 %v1942_v30  ;;  %v1952_v22 = vand.u32 2147483647, %v1942_v30 }
 0x38a   : > { %v1955_v7 = vor.u32 1.1754944e-38, %v1954_v33  ;;  %vm1953_vm11 = vcmp.eq.f32.partialorder %v1952_v22, 8.507059e+37 }
 0x38c   : > { %v2946_v37 = vpop.eup %2945 }
 0x38d   : > { %v1887_v24 = vadd.f32 1.0, %v2946_v37 }
 0x38e   : > { %v2948_v53 = vpop.eup %2947 }
 0x38f   : > { %v1944_v47 = vmul.f32 %v2948_v53, %v1942_v30  ;;  %2949 = vrcp.f32 %v1887_v24  ;;  %vm1949_vm8 = vweird.f32 %v2948_v53  ;;  %v1899_v40 = vand.u32 2147483648, %v1887_v24 }
 0x390   : > { %vm1950_vm10 = vmor %vm1948_vm9, %vm1949_vm8  ;;  %v1897_v25 = vand.u32 2147483647, %v1887_v24  ;;  %vm1893_vm13 = vweird.f32 %v1887_v24 }
 0x391   : > { %v1945_v59 = vsub.f32 1.0, %v1944_v47  ;;  %v1900_v57 = vor.u32 1.1754944e-38, %v1899_v40 }
 0x392   : > { %vm1898_vm15 = vcmp.eq.f32.partialorder %v1897_v25, 8.507059e+37 }
 0x393   : > { %v1946_v31 = vmul.f32 %v2948_v53, %v1945_v59 }
 0x395   : > { %v2950_v23 = vpop.eup %2949  ;;  %v1947_v19 = vadd.f32 %v2948_v53, %v1946_v31 }
 0x396   : > { %v1889_v62 = vmul.f32 %v2950_v23, %v1887_v24  ;;  %vm1894_vm12 = vweird.f32 %v2950_v23 }
 0x397   : > { %v1951_v3 = vsel %vm1950_vm10, %v2948_v53, %v1947_v19  ;;  %vm1895_vm14 = vmor %vm1893_vm13, %vm1894_vm12 }
 0x398   : > { %v1890_v2 = vsub.f32 1.0, %v1889_v62  ;;  %v1956_v61 = vsel %vm1953_vm11, %v1955_v7, %v1951_v3 }
 0x399   : > { %v1975_v10 = vperm.slane %v1956_v61, 0 }
 0x39a   : > { %v1891_v54 = vmul.f32 %v2950_v23, %v1890_v2 }
 0x39b   : > { %v1976_v39 = vmul.f32 %v1975_v10, %v4005_v0  ;;  %v1977_v8 = vmul.f32 %v1975_v10, %v3996_v51  ;;  %v1978_v48 = vmul.f32 %v1975_v10, %v4008_v11  ;;  %v1979_v27 = vmul.f32 %v1975_v10, %v4013_v6 }
 0x39c   : > { %v1892_v56 = vadd.f32 %v2950_v23, %v1891_v54  ;;  %v1990_v0 = vmul.f32 %v1975_v10, %v4129_v50  ;;  %v1991_v51 = vmul.f32 %v1975_v10, %v4135_v35 }
 0x39e   : > { %v1896_v1 = vsel %vm1895_vm14, %v2950_v23, %v1892_v56 }
 0x39f   : > { %v1901_v9 = vsel %vm1898_vm15, %v1900_v57, %v1896_v1 }
 0x3a0   : > { %v1958_v13 = vperm.slane %v1901_v9, 0 }
 0x3a2   : > { %v1959_v20 = vmul.f32 %v1958_v13, %v4033_v49  ;;  %v1960_v45 = vmul.f32 %v1958_v13, %v4024_v43  ;;  %v1961_v46 = vmul.f32 %v1958_v13, %v4036_v38  ;;  %v1962_v60 = vmul.f32 %v1958_v13, %v4063_v63 }
 0x3a3   : > { %v1973_v16 = vmul.f32 %v1958_v13, %v4145_v14  ;;  %v1974_v26 = vmul.f32 %v1958_v13, %v4148_v41  ;;  %v2155_v49 = vperm.slane %v4155_v52, 2  ;;  %v2188_v43 = vperm.slane %v4155_v52, 3 }
 0x3a4   : > { %v1992_v55 = vadd.f32 %v1976_v39, %v1959_v20  ;;  %v1993_v11 = vadd.f32 %v1977_v8, %v1960_v45  ;;  %v1994_v4 = vadd.f32 %v1978_v48, %v1961_v46  ;;  %v1995_v6 = vadd.f32 %v1979_v27, %v1962_v60  ;;  %v4266_v20 = vld [vmem:[#allocation4_spill] sm:$0xff] }
 0x3a5   : > { %v2006_v5 = vadd.f32 %v1990_v0, %v1973_v16  ;;  %v2007_v38 = vadd.f32 %v1991_v51, %v1974_v26  ;;  %v4267_v51 = vld [vmem:[#allocation3_spill] sm:$0xff] }
 0x3a6   : > { %v2009_v18 = vrot.slane %v1992_v55, 7  ;;  %v2010_v63 = vrot.slane %v1993_v11, 7  ;;  %v2011_v58 = vrot.slane %v1994_v4, 7  ;;  %v2058_v14 = vrot.slane %v1993_v11, 1 }
 0x3a7   : > { %v2059_v29 = vrot.slane %v1994_v4, 1  ;;  %v2060_v41 = vrot.slane %v1995_v6, 1  ;;  %v2124_v44 = vmul.f32 %v2122_v28, %v1993_v11  ;;  %v2125_v50 = vmul.f32 %v2122_v28, %v1994_v4 }
 0x3a8   : > { %v2038_v35 = vsel %vm687_vm1, %v2010_v63, %v2011_v58  ;;  %v2039_v42 = vsel %vm687_vm1, %v2009_v18, %v2010_v63  ;;  %v2023_v17 = vrot.slane %v2006_v5, 7  ;;  %v2024_v21 = vrot.slane %v2007_v38, 7 }
 0x3a9   : > { %v2085_v30 = vsel %vm816_vm2, %v2059_v29, %v2060_v41  ;;  %v2086_v37 = vsel %vm816_vm2, %v2058_v14, %v2059_v29  ;;  %v2107_v24 = vmul.f32 %v2105_v12, %v2039_v42  ;;  %v2108_v53 = vmul.f32 %v2105_v12, %v2038_v35 }
 0x3aa   : > { %v2157_v47 = vmul.f32 %v2155_v49, %v2086_v37  ;;  %v2158_v59 = vmul.f32 %v2155_v49, %v2085_v30  ;;  %v2025_v31 = vsel %vm687_vm1, %v2023_v17, %v2024_v21  ;;  %v2040_v33 = vsel %vm687_vm1, %v2024_v21, %v2009_v18 }
 0x3ab   : > { %v2140_v23 = vadd.f32 %v2124_v44, %v2107_v24  ;;  %v2141_v19 = vadd.f32 %v2125_v50, %v2108_v53  ;;  %v2041_v22 = vsel %vm363_vm0, %v2040_v33, 0.0  ;;  %v2057_v62 = vrot.slane %v1992_v55, 1 }
 0x3ac   : > { %v2072_v3 = vrot.slane %v2007_v38, 1  ;;  %v2106_v7 = vmul.f32 %v2105_v12, %v2041_v22  ;;  %v2121_v2 = vmul.f32 %v2105_v12, %v2025_v31  ;;  %v2123_v40 = vmul.f32 %v2122_v28, %v1992_v55 }
 0x3ad   : > { %v2173_v61 = vadd.f32 %v2157_v47, %v2140_v23  ;;  %v2174_v54 = vadd.f32 %v2158_v59, %v2141_v19  ;;  %v2087_v25 = vsel %vm816_vm2, %v2057_v62, %v2058_v14  ;;  %v2138_v56 = vmul.f32 %v2122_v28, %v2007_v38 }
 0x3ae   : > { %v2088_v10 = vsel %vm816_vm2, %v2072_v3, %v2057_v62  ;;  %v2139_v57 = vadd.f32 %v2123_v40, %v2106_v7  ;;  %v2156_v1 = vmul.f32 %v2155_v49, %v2087_v25  ;;  %v2334_v11 = vperm.slane %v4155_v52, 5 }
 0x3af   : > { %v2190_v9 = vadd.f32 %v2188_v43, %v2173_v61  ;;  %v2191_v13 = vadd.f32 %v2188_v43, %v2174_v54  ;;  %v2104_v39 = vsel %vm394_vm3, %v2088_v10, 0.0  ;;  %v2154_v8 = vadd.f32 %v2138_v56, %v2121_v2 }
 0x3b0   : > { %v2171_v48 = vmul.f32 %v2155_v49, %v2104_v39  ;;  %v2172_v12 = vadd.f32 %v2156_v1, %v2139_v57 }
 0x3b1   : > { %v2206_v27 = vmul.f32 %v2190_v9, %v3357_v32  ;;  %v2207_v45 = vmul.f32 %v2191_v13, %v4266_v20  ;;  %2577 = vmatpush.xpose.msrb.mxu3 %v2190_v9  ;;  %v2367_v32 = vperm.slane %v4155_v52, 6 }
 0x3b2   : > { %v2187_v46 = vadd.f32 %v2171_v48, %v2154_v8  ;;  %v2189_v28 = vadd.f32 %v2188_v43, %v2172_v12 }
 0x3b3   : > { %v2222_v60 = vrot.slane %v2206_v27, 7  ;;  %v2270_v16 = vrot.slane %v2206_v27, 1  ;;  %v2271_v26 = vrot.slane %v2207_v45, 1  ;;  %v2336_v18 = vmul.f32 %v2334_v11, %v2206_v27 }
 0x3b4   : > { %v2204_v0 = vadd.f32 %v2188_v43, %v2187_v46  ;;  %v2205_v55 = vmul.f32 %v2189_v28, %v4267_v51 }
 0x3b5   : > { %2578 = vmatpush.xpose.msrb.mxu3 %v2189_v28  ;;  %v2298_v5 = vsel %vm816_vm2, %v2270_v16, %v2271_v26 }
 0x3b6   : > { %v2220_v4 = vmul.f32 %v2204_v0, %v3876_v15  ;;  %v2221_v6 = vrot.slane %v2205_v55, 7  ;;  %v2269_v49 = vrot.slane %v2205_v55, 1  ;;  %v2400_v15 = vperm.slane %v4155_v52, 7  ;;  %v2951_v52 = vld [vmem:[%s3060_s20 + $0x10] sm:$0xff] }
 0x3b7   : > { %v2369_v14 = vmul.f32 %v2367_v32, %v2298_v5  ;;  %v2335_v35 = vmul.f32 %v2334_v11, %v2205_v55 }
 0x3b8   : > { %v2236_v38 = vrot.slane %v2220_v4, 7  ;;  %v2251_v43 = vsel %vm687_vm1, %v2221_v6, %v2222_v60  ;;  %2579 = vmatmul.f32.vlgmr.msrb.gmra.mxu3 %v2189_v28  ;;  %v2299_v41 = vsel %vm816_vm2, %v2269_v49, %v2270_v16 }
 0x3b9   : > { %v2319_v63 = vmul.f32 %v2317_v36, %v2251_v43  ;;  %v2368_v21 = vmul.f32 %v2367_v32, %v2299_v41 }
 0x3ba   : > { %v2252_v58 = vsel %vm687_vm1, %v2236_v38, %v2221_v6 }
 0x3bb   : > { %v2253_v29 = vsel %vm363_vm0, %v2252_v58, 0.0  ;;  %v2352_v44 = vadd.f32 %v2336_v18, %v2319_v63 }
 0x3bc   : > { %v2318_v50 = vmul.f32 %v2317_v36, %v2253_v29 }
 0x3bd   : > { %v2385_v42 = vadd.f32 %v2369_v14, %v2352_v44 }
 0x3be   : > { %v2351_v17 = vadd.f32 %v2335_v35, %v2318_v50 }
 0x3bf   : > { %v2402_v30 = vadd.f32 %v2400_v15, %v2385_v42 }
 0x3c0   : > { %v2384_v37 = vadd.f32 %v2368_v21, %v2351_v17  ;;  %2582 = vmatmul.f32.gmra.mxu3 %v2190_v9 }
 0x3c1   : > { %2514 = vst [vmem:[%s3060_s20 + $0x8] sm:$0xff] %v2402_v30 }
 0x3c2   : > { %v2401_v24 = vadd.f32 %v2400_v15, %v2384_v37 }
 0x3c4   : > { %2513 = vst [vmem:[%s3060_s20] sm:$0xff] %v2401_v24 }
 0x3c8   : > { %2585 = vmatmul.f32.gmra.mxu3 %v2951_v52 }
 0x3d0   : > { %2588 = vmatmul.f32.gmra.mxu3 %v2951_v52 }
 0x3d8   : > { %2591 = vmatmul.f32.gmra.mxu3 %v2951_v52 }
 0x3e0   : > { %2594 = vmatmul.f32.gmra.mxu3 %v2951_v52 }
 0x3e8   : > { %2597 = vmatmul.f32.gmra.mxu3 %v2951_v52 }
 0x3f0   : > { %2600 = vmatmul.f32.gmra.mxu3 %v2951_v52 }
 0x3f8   : > { %2603 = vmatmul.f32.gmra.mxu3 %v2951_v52 }
 0x400   : > { %2606 = vmatmul.f32.gmra.mxu3 %v2951_v52 }
 0x408   : > { %2609 = vmatmul.f32.gmra.mxu3 %v2951_v52 }
 0x410   : > { %2612 = vmatmul.f32.gmra.mxu3 %v2951_v52 }
 0x418   : > { %2615 = vmatmul.f32.gmra.mxu3 %v2951_v52 }
 0x420   : > { %2618 = vmatmul.f32.gmra.mxu3 %v2951_v52 }
 0x428   : > { %2621 = vmatmul.f32.gmra.mxu3 %v2951_v52 }
 0x430   : > { %2624 = vmatmul.f32.gmra.mxu3 %v2951_v52 }
 0x43b   : > { %v2580_v34 = vpop.f32.mrf.mxu3 }
 0x43c   : > { %2628 = vst [vmem:[%s4218_s9] sm:$0xff] %v2580_v34 }
 0x443   : > { %v2583_v53 = vpop.f32.mrf.mxu3 }
 0x444   : > { %2629 = vst [vmem:[%s4218_s9 + $0x8] sm:$0xff] %v2583_v53 }
 0x44b   : > { %v2586_v47 = vpop.f32.mrf.mxu3 }
 0x44c   : > { %2630 = vst [vmem:[%s4218_s9 + $0x10] sm:$0xff] %v2586_v47 }
 0x453   : > { %v2589_v59 = vpop.f32.mrf.mxu3 }
 0x454   : > { %2631 = vst [vmem:[%s4218_s9 + $0x18] sm:$0xff] %v2589_v59 }
 0x45b   : > { %v2592_v31 = vpop.f32.mrf.mxu3 }
 0x45c   : > { %2632 = vst [vmem:[%s4218_s9 + $0x20] sm:$0xff] %v2592_v31 }
 0x463   : > { %v2595_v33 = vpop.f32.mrf.mxu3 }
 0x464   : > { %2633 = vst [vmem:[%s4218_s9 + $0x28] sm:$0xff] %v2595_v33 }
 0x46b   : > { %v2598_v23 = vpop.f32.mrf.mxu3 }
 0x46c   : > { %2634 = vst [vmem:[%s4218_s9 + $0x30] sm:$0xff] %v2598_v23 }
 0x473   : > { %v2601_v19 = vpop.f32.mrf.mxu3 }
 0x474   : > { %2635 = vst [vmem:[%s4218_s9 + $0x38] sm:$0xff] %v2601_v19 }
 0x47b   : > { %v2604_v22 = vpop.f32.mrf.mxu3 }
 0x47c   : > { %2636 = vst [vmem:[%s4218_s9 + $0x40] sm:$0xff] %v2604_v22 }
 0x483   : > { %v2607_v62 = vpop.f32.mrf.mxu3 }
 0x484   : > { %2637 = vst [vmem:[%s4218_s9 + $0x48] sm:$0xff] %v2607_v62 }
 0x48b   : > { %v2610_v3 = vpop.f32.mrf.mxu3 }
 0x48c   : > { %2638 = vst [vmem:[%s4218_s9 + $0x50] sm:$0xff] %v2610_v3 }
 0x493   : > { %v2613_v7 = vpop.f32.mrf.mxu3 }
 0x494   : > { %2639 = vst [vmem:[%s4218_s9 + $0x58] sm:$0xff] %v2613_v7 }
 0x49b   : > { %v2616_v2 = vpop.f32.mrf.mxu3 }
 0x49c   : > { %2640 = vst [vmem:[%s4218_s9 + $0x60] sm:$0xff] %v2616_v2 }
 0x4a3   : > { %v2619_v40 = vpop.f32.mrf.mxu3 }
 0x4a4   : > { %2641 = vst [vmem:[%s4218_s9 + $0x68] sm:$0xff] %v2619_v40 }
 0x4ab   : > { %v2622_v61 = vpop.f32.mrf.mxu3 }
 0x4ac   : > { %2642 = vst [vmem:[%s4218_s9 + $0x70] sm:$0xff] %v2622_v61 }
 0x4b3   : > { %v2625_v54 = vpop.f32.mrf.mxu3 }
 0x4b4   : > { %2643 = vst [vmem:[%s4218_s9 + $0x78] sm:$0xff] %v2625_v54 }
 0x4b5 PF: > { %s19_s29 = sadd.s32 1, %s2974_s29   ;;  %s4268_s27 = smov %s2970_s28 }
 0x4b6   : > { %p16_p5 = scmp.ge.s32.totalorder %s19_s29, 4   ;;  %s4269_s28 = smov %s4271_s30 }
 0x4b8   :  { %18 = sbr.rel (!%p16_p5) target bundleno = 2 (0x2), region = 95 }

</bundles_post_ra>
